<compile_context>
chip_gen: v7x
topology: tpu7x:2x2x1
jax: 0.10.0
libtpu: 0.0.40
codegen_flags: <defaults>
</compile_context>

<pallas_src>
import math

import jax
import jax.numpy as jnp
from jax.experimental import pallas as pl
from jax.experimental.pallas import tpu as pltpu

_NUM_STATS = 22
_PRED_PAD = -1.0e4  # BCE(x=-1e4, g=0) == 0 exactly -> padding is loss-neutral

# stat base indices inside the (B, 22, 8, 128) partial-sum output
_LINE = 0    # [pos, bce*pos, bce]          channel 15, weights (1, 1)
_JUNC = 3    # [pos, bce*pos, bce]          channel 14, weights (1, 30)
_SOLC = 6    # [pos, bce*pos, bce]          channel 0,  weights (1, 30)
_TPC = 9     # [pos, bce*pos, bce]          channel 7,  weights (1, 30)
_SOLD = 12   # [pos, min(l1,l2)]            channels 1:5
_TPD = 14    # [pos, min(l1,l2)]            channels 8:12
_SOLA = 16   # [pos, len_l1*pos, ang_l1*pos] channels 5,6
_TPA = 19    # [pos, len_l1*pos, ang_l1*pos] channels 12,13


# ---------------- elementwise helpers (traced inside the kernel) ----------------------

def _smooth_l1(p, g):
    d = jnp.abs(p - g)
    return jnp.where(d < 1.0, 0.5 * d * d, d - 0.5)


def _bce_with_logits(x, g):
    # numerically stable binary_cross_entropy_with_logits, reduction='none'
    return jnp.maximum(x, 0.0) - x * g + jnp.log1p(jnp.exp(-jnp.abs(x)))


def _fold(x):
    # (S, 128) -> (8, 128): sum groups of 8 sublanes.  Layout-preserving reshape +
    # leading-axis sum == plain vreg adds (VPU); defers all cross-lane (XLU) work to
    # the tiny JAX finalize.
    s = x.shape[0]
    return jnp.sum(x.reshape(s // 8, 8, 128), axis=0)


# ------------------------------------ kernel ------------------------------------------

def _loss_kernel(preds_ref, gts_ref, out_ref):
    # preds_ref / gts_ref: (1, 16, SUB, 128) tile; out_ref: (1, 22, 8, 128) per-batch
    # accumulators, resident in VMEM across the chunk (reduction) grid axis.
    @pl.when(pl.program_id(1) == 0)
    def _():
        out_ref[...] = jnp.zeros_like(out_ref)

    def ch(ref, c):
        # per-channel load at point of use (short live ranges), upcast to f32
        return ref[0, c].astype(jnp.float32)

    def acc_bce(base, c):
        x = ch(preds_ref, c)
        g = ch(gts_ref, c)
        pos = (g != 0.0).astype(jnp.float32)
        l = _bce_with_logits(x, g)
        out_ref[0, base + 0] += _fold(pos)
        out_ref[0, base + 1] += _fold(l * pos)
        out_ref[0, base + 2] += _fold(l)        # neg sums derived in finalize

    def acc_disp(base, c0):
        gd = [ch(gts_ref, c0 + i) for i in range(4)]
        pd = [ch(preds_ref, c0 + i) for i in range(4)]
        pos = ((jnp.abs(gd[0]) + jnp.abs(gd[1]) + jnp.abs(gd[2]) + jnp.abs(gd[3]))
               != 0.0).astype(jnp.float32)
        pdm = [p * pos for p in pd]
        gdm = [g * pos for g in gd]
        l1 = (_smooth_l1(pdm[0], gdm[0]) + _smooth_l1(pdm[1], gdm[1])
              + _smooth_l1(pdm[2], gdm[2]) + _smooth_l1(pdm[3], gdm[3]))
        # swapped-endpoint prediction (x1,y1,x0,y0) against gt
        l2 = (_smooth_l1(pdm[2], gdm[0]) + _smooth_l1(pdm[3], gdm[1])
              + _smooth_l1(pdm[0], gdm[2]) + _smooth_l1(pdm[1], gdm[3]))
        out_ref[0, base + 0] += _fold(pos)
        out_ref[0, base + 1] += _fold(jnp.minimum(l1, l2))

    def acc_len_ang(base, c_len, c_ang):
        g_len = ch(gts_ref, c_len)
        g_ang = ch(gts_ref, c_ang)
        p_len = jax.nn.sigmoid(ch(preds_ref, c_len))
        p_ang = jax.nn.sigmoid(ch(preds_ref, c_ang))
        pos = (g_len != 0.0).astype(jnp.float32)
        out_ref[0, base + 0] += _fold(pos)
        out_ref[0, base + 1] += _fold(_smooth_l1(p_len, g_len) * pos)
        out_ref[0, base + 2] += _fold(_smooth_l1(p_ang, g_ang) * pos)

    acc_bce(_LINE, 15)
    acc_bce(_JUNC, 14)
    acc_bce(_SOLC, 0)
    acc_bce(_TPC, 7)
    acc_disp(_SOLD, 1)
    acc_disp(_TPD, 8)
    acc_len_ang(_SOLA, 5, 6)
    acc_len_ang(_TPA, 12, 13)


# ------------------------------ wrapper / finalize -------------------------------------

def _choose_tiling(hw):
    # pad H*W up to a multiple of 1024 (8 sublanes x 128 lanes); chunk = up to 8 such
    # units (<= 8192 elems -> block of 2 x 512 KiB f32, safe for v7x's 64 MiB VMEM).
    hw_pad = ((hw + 1023) // 1024) * 1024
    n_units = hw_pad // 1024
    d = max(k for k in range(1, 9) if n_units % k == 0)
    return hw_pad, d * 8, n_units // d  # (padded hw, sublane rows per block, n_chunks)


@jax.jit
def _loss_components(preds, gts):
    B, C, H, W = preds.shape
    assert C == 16, "LineSegmentLoss expects 16-channel maps"
    hw = H * W
    hw_pad, sub, n_chunks = _choose_tiling(hw)

    def prep(x, pad_value):
        x = x.reshape(B, C, hw)
        if hw_pad != hw:
            x = jnp.pad(x, ((0, 0), (0, 0), (0, hw_pad - hw)),
                        constant_values=pad_value)
        return x.reshape(B, C, hw_pad // 128, 128)

    p4 = prep(preds, _PRED_PAD)   # pad preds with -1e4 -> BCE/sigmoid terms vanish
    g4 = prep(gts, 0.0)           # pad gts with 0     -> all pos masks are 0

    itemsize = jnp.dtype(preds.dtype).itemsize
    total = B * C * hw_pad
    cost = pl.CostEstimate(
        flops=int(12 * total),
        transcendentals=int(10 * B * hw_pad),
        bytes_accessed=int(2 * total * itemsize + B * _NUM_STATS * 8 * 128 * 4),
    )

    raw = pl.pallas_call(
        _loss_kernel,
        out_shape=jax.ShapeDtypeStruct((B, _NUM_STATS, 8, 128), jnp.float32),
        grid=(B, n_chunks),
        in_specs=[pl.BlockSpec((1, C, sub, 128), lambda b, j: (b, 0, j, 0)),
                  pl.BlockSpec((1, C, sub, 128), lambda b, j: (b, 0, j, 0))],
        out_specs=pl.BlockSpec((1, _NUM_STATS, 8, 128), lambda b, j: (b, 0, 0, 0)),
        compiler_params=pltpu.CompilerParams(
            dimension_semantics=("parallel", "arbitrary")),
        cost_estimate=cost,
    )(p4, g4)

    # finalize: 22 cross-lane reductions + a handful of scalar divides (trivial XLA)
    partials = jnp.sum(raw, axis=(0, 2, 3))  # (22,) f32
    numel = jnp.float32(B * hw)              # true element count (padding excluded)

    def bce(base, pos_w, neg_w):
        s_pos = partials[base + 0]
        s_lpos = partials[base + 1]
        s_l = partials[base + 2]             # padded preds contribute exactly 0
        s_neg = numel - s_pos
        return (s_lpos / s_pos) * pos_w + ((s_l - s_lpos) / s_neg) * neg_w

    def disp(base):
        return partials[base + 1] / partials[base + 0]

    def len_ang(base):
        return (partials[base + 1] / partials[base + 0],
                partials[base + 2] / partials[base + 0])

    sol_len, sol_ang = len_ang(_SOLA)
    tp_len, tp_ang = len_ang(_TPA)
    return {
        'line_seg_loss': bce(_LINE, 1.0, 1.0),
        'junc_seg_loss': bce(_JUNC, 1.0, 30.0),
        'sol_center_loss': bce(_SOLC, 1.0, 30.0),
        'sol_displacement_loss': disp(_SOLD),
        'sol_len_loss': sol_len,
        'sol_angle_loss': sol_ang,
        'tp_center_loss': bce(_TPC, 1.0, 30.0),
        'tp_displacement_loss': disp(_TPD),
        'tp_len_loss': tp_len,
        'tp_angle_loss': tp_ang,
    }


_LOSS_W = {
    'tp_center_loss': 10.0, 'tp_displacement_loss': 1.0, 'tp_len_loss': 1.0,
    'tp_angle_loss': 1.0, 'tp_match_loss': 1.0, 'tp_centerness_loss': 1.0,
    'sol_center_loss': 1.0, 'sol_displacement_loss': 1.0, 'sol_len_loss': 1.0,
    'sol_angle_loss': 1.0, 'sol_match_loss': 1.0, 'sol_centerness_loss': 1.0,
    'line_seg_loss': 1.0, 'junc_seg_loss': 1.0,
}


def line_segment_loss(preds, gts, tp_gt_lines_512_list=None, sol_gt_lines_512_list=None):
    del tp_gt_lines_512_list, sol_gt_lines_512_list  # only used by match loss (disabled)
    comps = _loss_components(preds, gts)

    zero = jnp.float32(0.0)
    loss_dict = dict(comps)
    loss_dict.update({'sol_match_loss': zero, 'tp_match_loss': zero,
                      'tp_match_ratio': zero})

    loss = jnp.float32(0.0)
    for k in list(loss_dict.keys()):
        if k in _LOSS_W:
            loss_dict[k] = loss_dict[k] * _LOSS_W[k]
            loss = loss + loss_dict[k]
    loss_dict['loss'] = loss

    # with_SOL_loss == True aggregates
    loss_dict['center_loss'] = loss_dict['sol_center_loss'] + loss_dict['tp_center_loss']
    loss_dict['displacement_loss'] = (loss_dict['sol_displacement_loss']
                                      + loss_dict['tp_displacement_loss'])
    loss_dict['match_loss'] = loss_dict['tp_match_loss'] + loss_dict['sol_match_loss']
    loss_dict['match_ratio'] = loss_dict['tp_match_ratio']
    return loss_dict


# ------------------------------ pure-JAX reference (check only) ------------------------

def _reference_components(preds, gts):
    f32 = jnp.float32
    preds = preds.astype(f32)
    gts = gts.astype(f32)

    def wbce(x, g, pw, nw):
        pos = (g != 0.0).astype(f32)
        neg = 1.0 - pos
        l = _bce_with_logits(x, g)
        return (l * pos).sum() / pos.sum() * pw + (l * neg).sum() / neg.sum() * nw

    def disp(pd, gd):
        pos = ((jnp.abs(gd[:, 0]) + jnp.abs(gd[:, 1])
                + jnp.abs(gd[:, 2]) + jnp.abs(gd[:, 3])) != 0.0).astype(f32)
        ps = pos.sum()
        pd = pd * pos[:, None]
        gd = gd * pos[:, None]
        l1 = _smooth_l1(pd, gd).sum(axis=1)
        pd2 = jnp.concatenate([pd[:, 2:], pd[:, :2]], axis=1)
        l2 = _smooth_l1(pd2, gd).sum(axis=1)
        return jnp.minimum(l1, l2).sum() / ps

    def lenang(p_len, p_ang, g_len, g_ang):
        p_len = jax.nn.sigmoid(p_len)
        p_ang = jax.nn.sigmoid(p_ang)
        pos = (g_len != 0.0).astype(f32)
        ps = pos.sum()
        return ((_smooth_l1(p_len, g_len) * pos).sum() / ps,
                (_smooth_l1(p_ang, g_ang) * pos).sum() / ps)

    sol_len, sol_ang = lenang(preds[:, 5], preds[:, 6], gts[:, 5], gts[:, 6])
    tp_len, tp_ang = lenang(preds[:, 12], preds[:, 13], gts[:, 12], gts[:, 13])
    return {
        'line_seg_loss': wbce(preds[:, 15], gts[:, 15], 1.0, 1.0),
        'junc_seg_loss': wbce(preds[:, 14], gts[:, 14], 1.0, 30.0),
        'sol_center_loss': wbce(preds[:, 0], gts[:, 0], 1.0, 30.0),
        'sol_displacement_loss': disp(preds[:, 1:5], gts[:, 1:5]),
        'sol_len_loss': sol_len, 'sol_angle_loss': sol_ang,
        'tp_center_loss': wbce(preds[:, 7], gts[:, 7], 1.0, 30.0),
        'tp_displacement_loss': disp(preds[:, 8:12], gts[:, 8:12]),
        'tp_len_loss': tp_len, 'tp_angle_loss': tp_ang,
    }


if __name__ == "__main__":
    key = jax.random.PRNGKey(0)
    k1, k2 = jax.random.split(key)

    B, C, H, W = 2, 16, 16, 16
    preds = jax.random.normal(k1, (B, C, H, W), dtype=jnp.float32)
    # GT maps: mix of zeros and positive values so every pos/neg mask is non-degenerate
    u = jax.random.uniform(k2, (B, C, H, W), dtype=jnp.float32)
    gts = jnp.where(u > 0.5, u, 0.0)

    out = line_segment_loss(preds, gts, tp_gt_lines_512_list=[], sol_gt_lines_512_list=[])
    jax.block_until_ready(out['loss'])

    # correctness check against a pure-JAX reference of the PyTorch math
    comps = _loss_components(preds, gts)
    ref = _reference_components(preds, gts)
    for name, rv in ref.items():
        kv = float(comps[name])
        rv = float(rv)
        assert abs(kv - rv) <= 1e-3 * max(1.0, abs(rv)), (name, kv, rv)

    print("KERNEL_OK")
</pallas_src>

<mosaic_0001>
module attributes {stable_mosaic.version = 11 : i64} {
  func.func @_loss_kernel(%arg0: i32, %arg1: i32, %arg2: memref<1x16x8x128xf32, #tpu.memory_space<vmem>>, %arg3: memref<1x16x8x128xf32, #tpu.memory_space<vmem>>, %arg4: memref<1x22x8x128xf32, #tpu.memory_space<vmem>>) attributes {dimension_semantics = [#tpu.dimension_semantics<parallel>, #tpu.dimension_semantics<arbitrary>], iteration_bounds = array<i64: 2, 1>, scalar_prefetch = 0 : i64, scratch_operands = 0 : i64, tpu.core_type = #tpu.core_type<tc>, window_params = [{transform_indices = @transform_0, window_bounds = array<i64: 1, 16, 8, 128>}, {transform_indices = @transform_1, window_bounds = array<i64: 1, 16, 8, 128>}, {transform_indices = @transform_2, window_bounds = array<i64: 1, 22, 8, 128>}]} {
    %c0_i32 = arith.constant 0 : i32
    %0 = arith.cmpi eq, %arg1, %c0_i32 : i32
    %1 = arith.extui %0 : i1 to i32
    %c0_i32_0 = arith.constant 0 : i32
    %2 = arith.cmpi ne, %1, %c0_i32_0 : i32
    scf.if %2 {
      %cst_384 = arith.constant 0.000000e+00 : f32
      %587 = vector.broadcast %cst_384 : f32 to vector<1x22x8x128xf32>
      %c0_385 = arith.constant 0 : index
      %c0_386 = arith.constant 0 : index
      %c0_387 = arith.constant 0 : index
      %c0_388 = arith.constant 0 : index
      %588 = vector.load %arg4[%c0_385, %c0_386, %c0_387, %c0_388] : memref<1x22x8x128xf32, #tpu.memory_space<vmem>>, vector<1x22x8x128xf32>
      tpu.vector_store %arg4[%c0_385, %c0_386, %c0_387, %c0_388], %587 {strides = array<i32>} : memref<1x22x8x128xf32, #tpu.memory_space<vmem>>, vector<1x22x8x128xf32>,
    } else {
    }
    %c0 = arith.constant 0 : index
    %c15 = arith.constant 15 : index
    %c0_1 = arith.constant 0 : index
    %c0_2 = arith.constant 0 : index
    %3 = vector.load %arg2[%c0, %c15, %c0_1, %c0_2] : memref<1x16x8x128xf32, #tpu.memory_space<vmem>>, vector<1x1x8x128xf32>
    %4 = vector.shape_cast %3 : vector<1x1x8x128xf32> to vector<8x128xf32>
    %c0_3 = arith.constant 0 : index
    %c15_4 = arith.constant 15 : index
    %c0_5 = arith.constant 0 : index
    %c0_6 = arith.constant 0 : index
    %5 = vector.load %arg3[%c0_3, %c15_4, %c0_5, %c0_6] : memref<1x16x8x128xf32, #tpu.memory_space<vmem>>, vector<1x1x8x128xf32>
    %6 = vector.shape_cast %5 : vector<1x1x8x128xf32> to vector<8x128xf32>
    %cst = arith.constant 0.000000e+00 : f32
    %7 = vector.broadcast %cst : f32 to vector<8x128xf32>
    %8 = arith.cmpf one, %6, %7 : vector<8x128xf32>
    %9 = arith.extui %8 : vector<8x128xi1> to vector<8x128xi32>
    %10 = arith.sitofp %9 : vector<8x128xi32> to vector<8x128xf32>
    %cst_7 = arith.constant 0.000000e+00 : f32
    %11 = vector.broadcast %cst_7 : f32 to vector<8x128xf32>
    %12 = arith.maximumf %4, %11 : vector<8x128xf32>
    %13 = arith.mulf %4, %6 : vector<8x128xf32>
    %14 = arith.subf %12, %13 : vector<8x128xf32>
    %15 = math.absf %4 : vector<8x128xf32>
    %cst_8 = arith.constant 0.000000e+00 : f32
    %16 = vector.broadcast %cst_8 : f32 to vector<8x128xf32>
    %17 = arith.subf %16, %15 : vector<8x128xf32>
    %18 = math.exp %17 : vector<8x128xf32>
    %19 = math.log1p %18 : vector<8x128xf32>
    %20 = arith.addf %14, %19 : vector<8x128xf32>
    %c0_9 = arith.constant 0 : index
    %c0_10 = arith.constant 0 : index
    %c0_11 = arith.constant 0 : index
    %c0_12 = arith.constant 0 : index
    %21 = vector.load %arg4[%c0_9, %c0_10, %c0_11, %c0_12] : memref<1x22x8x128xf32, #tpu.memory_space<vmem>>, vector<1x1x8x128xf32>
    %22 = vector.shape_cast %21 : vector<1x1x8x128xf32> to vector<8x128xf32>
    %23 = vector.shape_cast %10 : vector<8x128xf32> to vector<1x8x128xf32>
    %cst_13 = arith.constant dense<0.000000e+00> : vector<8x128xf32>
    %24 = vector.multi_reduction <add>, %23, %cst_13 [0] : vector<1x8x128xf32> to vector<8x128xf32>
    %25 = arith.addf %22, %24 : vector<8x128xf32>
    %c0_14 = arith.constant 0 : index
    %c0_15 = arith.constant 0 : index
    %c0_16 = arith.constant 0 : index
    %c0_17 = arith.constant 0 : index
    %26 = vector.load %arg4[%c0_14, %c0_15, %c0_16, %c0_17] : memref<1x22x8x128xf32, #tpu.memory_space<vmem>>, vector<1x1x8x128xf32>
    %27 = vector.shape_cast %26 : vector<1x1x8x128xf32> to vector<8x128xf32>
    %28 = vector.shape_cast %25 : vector<8x128xf32> to vector<1x1x8x128xf32>
    tpu.vector_store %arg4[%c0_14, %c0_15, %c0_16, %c0_17], %28 {strides = array<i32>} : memref<1x22x8x128xf32, #tpu.memory_space<vmem>>, vector<1x1x8x128xf32>,
    %c0_18 = arith.constant 0 : index
    %c1 = arith.constant 1 : index
    %c0_19 = arith.constant 0 : index
    %c0_20 = arith.constant 0 : index
    %29 = vector.load %arg4[%c0_18, %c1, %c0_19, %c0_20] : memref<1x22x8x128xf32, #tpu.memory_space<vmem>>, vector<1x1x8x128xf32>
    %30 = vector.shape_cast %29 : vector<1x1x8x128xf32> to vector<8x128xf32>
    %31 = arith.mulf %20, %10 : vector<8x128xf32>
    %32 = vector.shape_cast %31 : vector<8x128xf32> to vector<1x8x128xf32>
    %cst_21 = arith.constant dense<0.000000e+00> : vector<8x128xf32>
    %33 = vector.multi_reduction <add>, %32, %cst_21 [0] : vector<1x8x128xf32> to vector<8x128xf32>
    %34 = arith.addf %30, %33 : vector<8x128xf32>
    %c0_22 = arith.constant 0 : index
    %c1_23 = arith.constant 1 : index
    %c0_24 = arith.constant 0 : index
    %c0_25 = arith.constant 0 : index
    %35 = vector.load %arg4[%c0_22, %c1_23, %c0_24, %c0_25] : memref<1x22x8x128xf32, #tpu.memory_space<vmem>>, vector<1x1x8x128xf32>
    %36 = vector.shape_cast %35 : vector<1x1x8x128xf32> to vector<8x128xf32>
    %37 = vector.shape_cast %34 : vector<8x128xf32> to vector<1x1x8x128xf32>
    tpu.vector_store %arg4[%c0_22, %c1_23, %c0_24, %c0_25], %37 {strides = array<i32>} : memref<1x22x8x128xf32, #tpu.memory_space<vmem>>, vector<1x1x8x128xf32>,
    %c0_26 = arith.constant 0 : index
    %c2 = arith.constant 2 : index
    %c0_27 = arith.constant 0 : index
    %c0_28 = arith.constant 0 : index
    %38 = vector.load %arg4[%c0_26, %c2, %c0_27, %c0_28] : memref<1x22x8x128xf32, #tpu.memory_space<vmem>>, vector<1x1x8x128xf32>
    %39 = vector.shape_cast %38 : vector<1x1x8x128xf32> to vector<8x128xf32>
    %40 = vector.shape_cast %20 : vector<8x128xf32> to vector<1x8x128xf32>
    %cst_29 = arith.constant dense<0.000000e+00> : vector<8x128xf32>
    %41 = vector.multi_reduction <add>, %40, %cst_29 [0] : vector<1x8x128xf32> to vector<8x128xf32>
    %42 = arith.addf %39, %41 : vector<8x128xf32>
    %c0_30 = arith.constant 0 : index
    %c2_31 = arith.constant 2 : index
    %c0_32 = arith.constant 0 : index
    %c0_33 = arith.constant 0 : index
    %43 = vector.load %arg4[%c0_30, %c2_31, %c0_32, %c0_33] : memref<1x22x8x128xf32, #tpu.memory_space<vmem>>, vector<1x1x8x128xf32>
    %44 = vector.shape_cast %43 : vector<1x1x8x128xf32> to vector<8x128xf32>
    %45 = vector.shape_cast %42 : vector<8x128xf32> to vector<1x1x8x128xf32>
    tpu.vector_store %arg4[%c0_30, %c2_31, %c0_32, %c0_33], %45 {strides = array<i32>} : memref<1x22x8x128xf32, #tpu.memory_space<vmem>>, vector<1x1x8x128xf32>,
    %c0_34 = arith.constant 0 : index
    %c14 = arith.constant 14 : index
    %c0_35 = arith.constant 0 : index
    %c0_36 = arith.constant 0 : index
    %46 = vector.load %arg2[%c0_34, %c14, %c0_35, %c0_36] : memref<1x16x8x128xf32, #tpu.memory_space<vmem>>, vector<1x1x8x128xf32>
    %47 = vector.shape_cast %46 : vector<1x1x8x128xf32> to vector<8x128xf32>
    %c0_37 = arith.constant 0 : index
    %c14_38 = arith.constant 14 : index
    %c0_39 = arith.constant 0 : index
    %c0_40 = arith.constant 0 : index
    %48 = vector.load %arg3[%c0_37, %c14_38, %c0_39, %c0_40] : memref<1x16x8x128xf32, #tpu.memory_space<vmem>>, vector<1x1x8x128xf32>
    %49 = vector.shape_cast %48 : vector<1x1x8x128xf32> to vector<8x128xf32>
    %cst_41 = arith.constant 0.000000e+00 : f32
    %50 = vector.broadcast %cst_41 : f32 to vector<8x128xf32>
    %51 = arith.cmpf one, %49, %50 : vector<8x128xf32>
    %52 = arith.extui %51 : vector<8x128xi1> to vector<8x128xi32>
    %53 = arith.sitofp %52 : vector<8x128xi32> to vector<8x128xf32>
    %cst_42 = arith.constant 0.000000e+00 : f32
    %54 = vector.broadcast %cst_42 : f32 to vector<8x128xf32>
    %55 = arith.maximumf %47, %54 : vector<8x128xf32>
    %56 = arith.mulf %47, %49 : vector<8x128xf32>
    %57 = arith.subf %55, %56 : vector<8x128xf32>
    %58 = math.absf %47 : vector<8x128xf32>
    %cst_43 = arith.constant 0.000000e+00 : f32
    %59 = vector.broadcast %cst_43 : f32 to vector<8x128xf32>
    %60 = arith.subf %59, %58 : vector<8x128xf32>
    %61 = math.exp %60 : vector<8x128xf32>
    %62 = math.log1p %61 : vector<8x128xf32>
    %63 = arith.addf %57, %62 : vector<8x128xf32>
    %c0_44 = arith.constant 0 : index
    %c3 = arith.constant 3 : index
    %c0_45 = arith.constant 0 : index
    %c0_46 = arith.constant 0 : index
    %64 = vector.load %arg4[%c0_44, %c3, %c0_45, %c0_46] : memref<1x22x8x128xf32, #tpu.memory_space<vmem>>, vector<1x1x8x128xf32>
    %65 = vector.shape_cast %64 : vector<1x1x8x128xf32> to vector<8x128xf32>
    %66 = vector.shape_cast %53 : vector<8x128xf32> to vector<1x8x128xf32>
    %cst_47 = arith.constant dense<0.000000e+00> : vector<8x128xf32>
    %67 = vector.multi_reduction <add>, %66, %cst_47 [0] : vector<1x8x128xf32> to vector<8x128xf32>
    %68 = arith.addf %65, %67 : vector<8x128xf32>
    %c0_48 = arith.constant 0 : index
    %c3_49 = arith.constant 3 : index
    %c0_50 = arith.constant 0 : index
    %c0_51 = arith.constant 0 : index
    %69 = vector.load %arg4[%c0_48, %c3_49, %c0_50, %c0_51] : memref<1x22x8x128xf32, #tpu.memory_space<vmem>>, vector<1x1x8x128xf32>
    %70 = vector.shape_cast %69 : vector<1x1x8x128xf32> to vector<8x128xf32>
    %71 = vector.shape_cast %68 : vector<8x128xf32> to vector<1x1x8x128xf32>
    tpu.vector_store %arg4[%c0_48, %c3_49, %c0_50, %c0_51], %71 {strides = array<i32>} : memref<1x22x8x128xf32, #tpu.memory_space<vmem>>, vector<1x1x8x128xf32>,
    %c0_52 = arith.constant 0 : index
    %c4 = arith.constant 4 : index
    %c0_53 = arith.constant 0 : index
    %c0_54 = arith.constant 0 : index
    %72 = vector.load %arg4[%c0_52, %c4, %c0_53, %c0_54] : memref<1x22x8x128xf32, #tpu.memory_space<vmem>>, vector<1x1x8x128xf32>
    %73 = vector.shape_cast %72 : vector<1x1x8x128xf32> to vector<8x128xf32>
    %74 = arith.mulf %63, %53 : vector<8x128xf32>
    %75 = vector.shape_cast %74 : vector<8x128xf32> to vector<1x8x128xf32>
    %cst_55 = arith.constant dense<0.000000e+00> : vector<8x128xf32>
    %76 = vector.multi_reduction <add>, %75, %cst_55 [0] : vector<1x8x128xf32> to vector<8x128xf32>
    %77 = arith.addf %73, %76 : vector<8x128xf32>
    %c0_56 = arith.constant 0 : index
    %c4_57 = arith.constant 4 : index
    %c0_58 = arith.constant 0 : index
    %c0_59 = arith.constant 0 : index
    %78 = vector.load %arg4[%c0_56, %c4_57, %c0_58, %c0_59] : memref<1x22x8x128xf32, #tpu.memory_space<vmem>>, vector<1x1x8x128xf32>
    %79 = vector.shape_cast %78 : vector<1x1x8x128xf32> to vector<8x128xf32>
    %80 = vector.shape_cast %77 : vector<8x128xf32> to vector<1x1x8x128xf32>
    tpu.vector_store %arg4[%c0_56, %c4_57, %c0_58, %c0_59], %80 {strides = array<i32>} : memref<1x22x8x128xf32, #tpu.memory_space<vmem>>, vector<1x1x8x128xf32>,
    %c0_60 = arith.constant 0 : index
    %c5 = arith.constant 5 : index
    %c0_61 = arith.constant 0 : index
    %c0_62 = arith.constant 0 : index
    %81 = vector.load %arg4[%c0_60, %c5, %c0_61, %c0_62] : memref<1x22x8x128xf32, #tpu.memory_space<vmem>>, vector<1x1x8x128xf32>
    %82 = vector.shape_cast %81 : vector<1x1x8x128xf32> to vector<8x128xf32>
    %83 = vector.shape_cast %63 : vector<8x128xf32> to vector<1x8x128xf32>
    %cst_63 = arith.constant dense<0.000000e+00> : vector<8x128xf32>
    %84 = vector.multi_reduction <add>, %83, %cst_63 [0] : vector<1x8x128xf32> to vector<8x128xf32>
    %85 = arith.addf %82, %84 : vector<8x128xf32>
    %c0_64 = arith.constant 0 : index
    %c5_65 = arith.constant 5 : index
    %c0_66 = arith.constant 0 : index
    %c0_67 = arith.constant 0 : index
    %86 = vector.load %arg4[%c0_64, %c5_65, %c0_66, %c0_67] : memref<1x22x8x128xf32, #tpu.memory_space<vmem>>, vector<1x1x8x128xf32>
    %87 = vector.shape_cast %86 : vector<1x1x8x128xf32> to vector<8x128xf32>
    %88 = vector.shape_cast %85 : vector<8x128xf32> to vector<1x1x8x128xf32>
    tpu.vector_store %arg4[%c0_64, %c5_65, %c0_66, %c0_67], %88 {strides = array<i32>} : memref<1x22x8x128xf32, #tpu.memory_space<vmem>>, vector<1x1x8x128xf32>,
    %c0_68 = arith.constant 0 : index
    %c0_69 = arith.constant 0 : index
    %c0_70 = arith.constant 0 : index
    %c0_71 = arith.constant 0 : index
    %89 = vector.load %arg2[%c0_68, %c0_69, %c0_70, %c0_71] : memref<1x16x8x128xf32, #tpu.memory_space<vmem>>, vector<1x1x8x128xf32>
    %90 = vector.shape_cast %89 : vector<1x1x8x128xf32> to vector<8x128xf32>
    %c0_72 = arith.constant 0 : index
    %c0_73 = arith.constant 0 : index
    %c0_74 = arith.constant 0 : index
    %c0_75 = arith.constant 0 : index
    %91 = vector.load %arg3[%c0_72, %c0_73, %c0_74, %c0_75] : memref<1x16x8x128xf32, #tpu.memory_space<vmem>>, vector<1x1x8x128xf32>
    %92 = vector.shape_cast %91 : vector<1x1x8x128xf32> to vector<8x128xf32>
    %cst_76 = arith.constant 0.000000e+00 : f32
    %93 = vector.broadcast %cst_76 : f32 to vector<8x128xf32>
    %94 = arith.cmpf one, %92, %93 : vector<8x128xf32>
    %95 = arith.extui %94 : vector<8x128xi1> to vector<8x128xi32>
    %96 = arith.sitofp %95 : vector<8x128xi32> to vector<8x128xf32>
    %cst_77 = arith.constant 0.000000e+00 : f32
    %97 = vector.broadcast %cst_77 : f32 to vector<8x128xf32>
    %98 = arith.maximumf %90, %97 : vector<8x128xf32>
    %99 = arith.mulf %90, %92 : vector<8x128xf32>
    %100 = arith.subf %98, %99 : vector<8x128xf32>
    %101 = math.absf %90 : vector<8x128xf32>
    %cst_78 = arith.constant 0.000000e+00 : f32
    %102 = vector.broadcast %cst_78 : f32 to vector<8x128xf32>
    %103 = arith.subf %102, %101 : vector<8x128xf32>
    %104 = math.exp %103 : vector<8x128xf32>
    %105 = math.log1p %104 : vector<8x128xf32>
    %106 = arith.addf %100, %105 : vector<8x128xf32>
    %c0_79 = arith.constant 0 : index
    %c6 = arith.constant 6 : index
    %c0_80 = arith.constant 0 : index
    %c0_81 = arith.constant 0 : index
    %107 = vector.load %arg4[%c0_79, %c6, %c0_80, %c0_81] : memref<1x22x8x128xf32, #tpu.memory_space<vmem>>, vector<1x1x8x128xf32>
    %108 = vector.shape_cast %107 : vector<1x1x8x128xf32> to vector<8x128xf32>
    %109 = vector.shape_cast %96 : vector<8x128xf32> to vector<1x8x128xf32>
    %cst_82 = arith.constant dense<0.000000e+00> : vector<8x128xf32>
    %110 = vector.multi_reduction <add>, %109, %cst_82 [0] : vector<1x8x128xf32> to vector<8x128xf32>
    %111 = arith.addf %108, %110 : vector<8x128xf32>
    %c0_83 = arith.constant 0 : index
    %c6_84 = arith.constant 6 : index
    %c0_85 = arith.constant 0 : index
    %c0_86 = arith.constant 0 : index
    %112 = vector.load %arg4[%c0_83, %c6_84, %c0_85, %c0_86] : memref<1x22x8x128xf32, #tpu.memory_space<vmem>>, vector<1x1x8x128xf32>
    %113 = vector.shape_cast %112 : vector<1x1x8x128xf32> to vector<8x128xf32>
    %114 = vector.shape_cast %111 : vector<8x128xf32> to vector<1x1x8x128xf32>
    tpu.vector_store %arg4[%c0_83, %c6_84, %c0_85, %c0_86], %114 {strides = array<i32>} : memref<1x22x8x128xf32, #tpu.memory_space<vmem>>, vector<1x1x8x128xf32>,
    %c0_87 = arith.constant 0 : index
    %c7 = arith.constant 7 : index
    %c0_88 = arith.constant 0 : index
    %c0_89 = arith.constant 0 : index
    %115 = vector.load %arg4[%c0_87, %c7, %c0_88, %c0_89] : memref<1x22x8x128xf32, #tpu.memory_space<vmem>>, vector<1x1x8x128xf32>
    %116 = vector.shape_cast %115 : vector<1x1x8x128xf32> to vector<8x128xf32>
    %117 = arith.mulf %106, %96 : vector<8x128xf32>
    %118 = vector.shape_cast %117 : vector<8x128xf32> to vector<1x8x128xf32>
    %cst_90 = arith.constant dense<0.000000e+00> : vector<8x128xf32>
    %119 = vector.multi_reduction <add>, %118, %cst_90 [0] : vector<1x8x128xf32> to vector<8x128xf32>
    %120 = arith.addf %116, %119 : vector<8x128xf32>
    %c0_91 = arith.constant 0 : index
    %c7_92 = arith.constant 7 : index
    %c0_93 = arith.constant 0 : index
    %c0_94 = arith.constant 0 : index
    %121 = vector.load %arg4[%c0_91, %c7_92, %c0_93, %c0_94] : memref<1x22x8x128xf32, #tpu.memory_space<vmem>>, vector<1x1x8x128xf32>
    %122 = vector.shape_cast %121 : vector<1x1x8x128xf32> to vector<8x128xf32>
    %123 = vector.shape_cast %120 : vector<8x128xf32> to vector<1x1x8x128xf32>
    tpu.vector_store %arg4[%c0_91, %c7_92, %c0_93, %c0_94], %123 {strides = array<i32>} : memref<1x22x8x128xf32, #tpu.memory_space<vmem>>, vector<1x1x8x128xf32>,
    %c0_95 = arith.constant 0 : index
    %c8 = arith.constant 8 : index
    %c0_96 = arith.constant 0 : index
    %c0_97 = arith.constant 0 : index
    %124 = vector.load %arg4[%c0_95, %c8, %c0_96, %c0_97] : memref<1x22x8x128xf32, #tpu.memory_space<vmem>>, vector<1x1x8x128xf32>
    %125 = vector.shape_cast %124 : vector<1x1x8x128xf32> to vector<8x128xf32>
    %126 = vector.shape_cast %106 : vector<8x128xf32> to vector<1x8x128xf32>
    %cst_98 = arith.constant dense<0.000000e+00> : vector<8x128xf32>
    %127 = vector.multi_reduction <add>, %126, %cst_98 [0] : vector<1x8x128xf32> to vector<8x128xf32>
    %128 = arith.addf %125, %127 : vector<8x128xf32>
    %c0_99 = arith.constant 0 : index
    %c8_100 = arith.constant 8 : index
    %c0_101 = arith.constant 0 : index
    %c0_102 = arith.constant 0 : index
    %129 = vector.load %arg4[%c0_99, %c8_100, %c0_101, %c0_102] : memref<1x22x8x128xf32, #tpu.memory_space<vmem>>, vector<1x1x8x128xf32>
    %130 = vector.shape_cast %129 : vector<1x1x8x128xf32> to vector<8x128xf32>
    %131 = vector.shape_cast %128 : vector<8x128xf32> to vector<1x1x8x128xf32>
    tpu.vector_store %arg4[%c0_99, %c8_100, %c0_101, %c0_102], %131 {strides = array<i32>} : memref<1x22x8x128xf32, #tpu.memory_space<vmem>>, vector<1x1x8x128xf32>,
    %c0_103 = arith.constant 0 : index
    %c7_104 = arith.constant 7 : index
    %c0_105 = arith.constant 0 : index
    %c0_106 = arith.constant 0 : index
    %132 = vector.load %arg2[%c0_103, %c7_104, %c0_105, %c0_106] : memref<1x16x8x128xf32, #tpu.memory_space<vmem>>, vector<1x1x8x128xf32>
    %133 = vector.shape_cast %132 : vector<1x1x8x128xf32> to vector<8x128xf32>
    %c0_107 = arith.constant 0 : index
    %c7_108 = arith.constant 7 : index
    %c0_109 = arith.constant 0 : index
    %c0_110 = arith.constant 0 : index
    %134 = vector.load %arg3[%c0_107, %c7_108, %c0_109, %c0_110] : memref<1x16x8x128xf32, #tpu.memory_space<vmem>>, vector<1x1x8x128xf32>
    %135 = vector.shape_cast %134 : vector<1x1x8x128xf32> to vector<8x128xf32>
    %cst_111 = arith.constant 0.000000e+00 : f32
    %136 = vector.broadcast %cst_111 : f32 to vector<8x128xf32>
    %137 = arith.cmpf one, %135, %136 : vector<8x128xf32>
    %138 = arith.extui %137 : vector<8x128xi1> to vector<8x128xi32>
    %139 = arith.sitofp %138 : vector<8x128xi32> to vector<8x128xf32>
    %cst_112 = arith.constant 0.000000e+00 : f32
    %140 = vector.broadcast %cst_112 : f32 to vector<8x128xf32>
    %141 = arith.maximumf %133, %140 : vector<8x128xf32>
    %142 = arith.mulf %133, %135 : vector<8x128xf32>
    %143 = arith.subf %141, %142 : vector<8x128xf32>
    %144 = math.absf %133 : vector<8x128xf32>
    %cst_113 = arith.constant 0.000000e+00 : f32
    %145 = vector.broadcast %cst_113 : f32 to vector<8x128xf32>
    %146 = arith.subf %145, %144 : vector<8x128xf32>
    %147 = math.exp %146 : vector<8x128xf32>
    %148 = math.log1p %147 : vector<8x128xf32>
    %149 = arith.addf %143, %148 : vector<8x128xf32>
    %c0_114 = arith.constant 0 : index
    %c9 = arith.constant 9 : index
    %c0_115 = arith.constant 0 : index
    %c0_116 = arith.constant 0 : index
    %150 = vector.load %arg4[%c0_114, %c9, %c0_115, %c0_116] : memref<1x22x8x128xf32, #tpu.memory_space<vmem>>, vector<1x1x8x128xf32>
    %151 = vector.shape_cast %150 : vector<1x1x8x128xf32> to vector<8x128xf32>
    %152 = vector.shape_cast %139 : vector<8x128xf32> to vector<1x8x128xf32>
    %cst_117 = arith.constant dense<0.000000e+00> : vector<8x128xf32>
    %153 = vector.multi_reduction <add>, %152, %cst_117 [0] : vector<1x8x128xf32> to vector<8x128xf32>
    %154 = arith.addf %151, %153 : vector<8x128xf32>
    %c0_118 = arith.constant 0 : index
    %c9_119 = arith.constant 9 : index
    %c0_120 = arith.constant 0 : index
    %c0_121 = arith.constant 0 : index
    %155 = vector.load %arg4[%c0_118, %c9_119, %c0_120, %c0_121] : memref<1x22x8x128xf32, #tpu.memory_space<vmem>>, vector<1x1x8x128xf32>
    %156 = vector.shape_cast %155 : vector<1x1x8x128xf32> to vector<8x128xf32>
    %157 = vector.shape_cast %154 : vector<8x128xf32> to vector<1x1x8x128xf32>
    tpu.vector_store %arg4[%c0_118, %c9_119, %c0_120, %c0_121], %157 {strides = array<i32>} : memref<1x22x8x128xf32, #tpu.memory_space<vmem>>, vector<1x1x8x128xf32>,
    %c0_122 = arith.constant 0 : index
    %c10 = arith.constant 10 : index
    %c0_123 = arith.constant 0 : index
    %c0_124 = arith.constant 0 : index
    %158 = vector.load %arg4[%c0_122, %c10, %c0_123, %c0_124] : memref<1x22x8x128xf32, #tpu.memory_space<vmem>>, vector<1x1x8x128xf32>
    %159 = vector.shape_cast %158 : vector<1x1x8x128xf32> to vector<8x128xf32>
    %160 = arith.mulf %149, %139 : vector<8x128xf32>
    %161 = vector.shape_cast %160 : vector<8x128xf32> to vector<1x8x128xf32>
    %cst_125 = arith.constant dense<0.000000e+00> : vector<8x128xf32>
    %162 = vector.multi_reduction <add>, %161, %cst_125 [0] : vector<1x8x128xf32> to vector<8x128xf32>
    %163 = arith.addf %159, %162 : vector<8x128xf32>
    %c0_126 = arith.constant 0 : index
    %c10_127 = arith.constant 10 : index
    %c0_128 = arith.constant 0 : index
    %c0_129 = arith.constant 0 : index
    %164 = vector.load %arg4[%c0_126, %c10_127, %c0_128, %c0_129] : memref<1x22x8x128xf32, #tpu.memory_space<vmem>>, vector<1x1x8x128xf32>
    %165 = vector.shape_cast %164 : vector<1x1x8x128xf32> to vector<8x128xf32>
    %166 = vector.shape_cast %163 : vector<8x128xf32> to vector<1x1x8x128xf32>
    tpu.vector_store %arg4[%c0_126, %c10_127, %c0_128, %c0_129], %166 {strides = array<i32>} : memref<1x22x8x128xf32, #tpu.memory_space<vmem>>, vector<1x1x8x128xf32>,
    %c0_130 = arith.constant 0 : index
    %c11 = arith.constant 11 : index
    %c0_131 = arith.constant 0 : index
    %c0_132 = arith.constant 0 : index
    %167 = vector.load %arg4[%c0_130, %c11, %c0_131, %c0_132] : memref<1x22x8x128xf32, #tpu.memory_space<vmem>>, vector<1x1x8x128xf32>
    %168 = vector.shape_cast %167 : vector<1x1x8x128xf32> to vector<8x128xf32>
    %169 = vector.shape_cast %149 : vector<8x128xf32> to vector<1x8x128xf32>
    %cst_133 = arith.constant dense<0.000000e+00> : vector<8x128xf32>
    %170 = vector.multi_reduction <add>, %169, %cst_133 [0] : vector<1x8x128xf32> to vector<8x128xf32>
    %171 = arith.addf %168, %170 : vector<8x128xf32>
    %c0_134 = arith.constant 0 : index
    %c11_135 = arith.constant 11 : index
    %c0_136 = arith.constant 0 : index
    %c0_137 = arith.constant 0 : index
    %172 = vector.load %arg4[%c0_134, %c11_135, %c0_136, %c0_137] : memref<1x22x8x128xf32, #tpu.memory_space<vmem>>, vector<1x1x8x128xf32>
    %173 = vector.shape_cast %172 : vector<1x1x8x128xf32> to vector<8x128xf32>
    %174 = vector.shape_cast %171 : vector<8x128xf32> to vector<1x1x8x128xf32>
    tpu.vector_store %arg4[%c0_134, %c11_135, %c0_136, %c0_137], %174 {strides = array<i32>} : memref<1x22x8x128xf32, #tpu.memory_space<vmem>>, vector<1x1x8x128xf32>,
    %c0_138 = arith.constant 0 : index
    %c1_139 = arith.constant 1 : index
    %c0_140 = arith.constant 0 : index
    %c0_141 = arith.constant 0 : index
    %175 = vector.load %arg3[%c0_138, %c1_139, %c0_140, %c0_141] : memref<1x16x8x128xf32, #tpu.memory_space<vmem>>, vector<1x1x8x128xf32>
    %176 = vector.shape_cast %175 : vector<1x1x8x128xf32> to vector<8x128xf32>
    %c0_142 = arith.constant 0 : index
    %c2_143 = arith.constant 2 : index
    %c0_144 = arith.constant 0 : index
    %c0_145 = arith.constant 0 : index
    %177 = vector.load %arg3[%c0_142, %c2_143, %c0_144, %c0_145] : memref<1x16x8x128xf32, #tpu.memory_space<vmem>>, vector<1x1x8x128xf32>
    %178 = vector.shape_cast %177 : vector<1x1x8x128xf32> to vector<8x128xf32>
    %c0_146 = arith.constant 0 : index
    %c3_147 = arith.constant 3 : index
    %c0_148 = arith.constant 0 : index
    %c0_149 = arith.constant 0 : index
    %179 = vector.load %arg3[%c0_146, %c3_147, %c0_148, %c0_149] : memref<1x16x8x128xf32, #tpu.memory_space<vmem>>, vector<1x1x8x128xf32>
    %180 = vector.shape_cast %179 : vector<1x1x8x128xf32> to vector<8x128xf32>
    %c0_150 = arith.constant 0 : index
    %c4_151 = arith.constant 4 : index
    %c0_152 = arith.constant 0 : index
    %c0_153 = arith.constant 0 : index
    %181 = vector.load %arg3[%c0_150, %c4_151, %c0_152, %c0_153] : memref<1x16x8x128xf32, #tpu.memory_space<vmem>>, vector<1x1x8x128xf32>
    %182 = vector.shape_cast %181 : vector<1x1x8x128xf32> to vector<8x128xf32>
    %c0_154 = arith.constant 0 : index
    %c1_155 = arith.constant 1 : index
    %c0_156 = arith.constant 0 : index
    %c0_157 = arith.constant 0 : index
    %183 = vector.load %arg2[%c0_154, %c1_155, %c0_156, %c0_157] : memref<1x16x8x128xf32, #tpu.memory_space<vmem>>, vector<1x1x8x128xf32>
    %184 = vector.shape_cast %183 : vector<1x1x8x128xf32> to vector<8x128xf32>
    %c0_158 = arith.constant 0 : index
    %c2_159 = arith.constant 2 : index
    %c0_160 = arith.constant 0 : index
    %c0_161 = arith.constant 0 : index
    %185 = vector.load %arg2[%c0_158, %c2_159, %c0_160, %c0_161] : memref<1x16x8x128xf32, #tpu.memory_space<vmem>>, vector<1x1x8x128xf32>
    %186 = vector.shape_cast %185 : vector<1x1x8x128xf32> to vector<8x128xf32>
    %c0_162 = arith.constant 0 : index
    %c3_163 = arith.constant 3 : index
    %c0_164 = arith.constant 0 : index
    %c0_165 = arith.constant 0 : index
    %187 = vector.load %arg2[%c0_162, %c3_163, %c0_164, %c0_165] : memref<1x16x8x128xf32, #tpu.memory_space<vmem>>, vector<1x1x8x128xf32>
    %188 = vector.shape_cast %187 : vector<1x1x8x128xf32> to vector<8x128xf32>
    %c0_166 = arith.constant 0 : index
    %c4_167 = arith.constant 4 : index
    %c0_168 = arith.constant 0 : index
    %c0_169 = arith.constant 0 : index
    %189 = vector.load %arg2[%c0_166, %c4_167, %c0_168, %c0_169] : memref<1x16x8x128xf32, #tpu.memory_space<vmem>>, vector<1x1x8x128xf32>
    %190 = vector.shape_cast %189 : vector<1x1x8x128xf32> to vector<8x128xf32>
    %191 = math.absf %176 : vector<8x128xf32>
    %192 = math.absf %178 : vector<8x128xf32>
    %193 = arith.addf %191, %192 : vector<8x128xf32>
    %194 = math.absf %180 : vector<8x128xf32>
    %195 = arith.addf %193, %194 : vector<8x128xf32>
    %196 = math.absf %182 : vector<8x128xf32>
    %197 = arith.addf %195, %196 : vector<8x128xf32>
    %cst_170 = arith.constant 0.000000e+00 : f32
    %198 = vector.broadcast %cst_170 : f32 to vector<8x128xf32>
    %199 = arith.cmpf one, %197, %198 : vector<8x128xf32>
    %200 = arith.extui %199 : vector<8x128xi1> to vector<8x128xi32>
    %201 = arith.sitofp %200 : vector<8x128xi32> to vector<8x128xf32>
    %202 = arith.mulf %184, %201 : vector<8x128xf32>
    %203 = arith.mulf %186, %201 : vector<8x128xf32>
    %204 = arith.mulf %188, %201 : vector<8x128xf32>
    %205 = arith.mulf %190, %201 : vector<8x128xf32>
    %206 = arith.mulf %176, %201 : vector<8x128xf32>
    %207 = arith.mulf %178, %201 : vector<8x128xf32>
    %208 = arith.mulf %180, %201 : vector<8x128xf32>
    %209 = arith.mulf %182, %201 : vector<8x128xf32>
    %210 = arith.subf %202, %206 : vector<8x128xf32>
    %211 = math.absf %210 : vector<8x128xf32>
    %cst_171 = arith.constant 1.000000e+00 : f32
    %212 = vector.broadcast %cst_171 : f32 to vector<8x128xf32>
    %213 = arith.cmpf olt, %211, %212 : vector<8x128xf32>
    %cst_172 = arith.constant 5.000000e-01 : f32
    %214 = vector.broadcast %cst_172 : f32 to vector<8x128xf32>
    %215 = arith.mulf %214, %211 : vector<8x128xf32>
    %216 = arith.mulf %215, %211 : vector<8x128xf32>
    %cst_173 = arith.constant 5.000000e-01 : f32
    %217 = vector.broadcast %cst_173 : f32 to vector<8x128xf32>
    %218 = arith.subf %211, %217 : vector<8x128xf32>
    %219 = arith.select %213, %216, %218 : vector<8x128xi1>, vector<8x128xf32>
    %220 = arith.subf %203, %207 : vector<8x128xf32>
    %221 = math.absf %220 : vector<8x128xf32>
    %cst_174 = arith.constant 1.000000e+00 : f32
    %222 = vector.broadcast %cst_174 : f32 to vector<8x128xf32>
    %223 = arith.cmpf olt, %221, %222 : vector<8x128xf32>
    %cst_175 = arith.constant 5.000000e-01 : f32
    %224 = vector.broadcast %cst_175 : f32 to vector<8x128xf32>
    %225 = arith.mulf %224, %221 : vector<8x128xf32>
    %226 = arith.mulf %225, %221 : vector<8x128xf32>
    %cst_176 = arith.constant 5.000000e-01 : f32
    %227 = vector.broadcast %cst_176 : f32 to vector<8x128xf32>
    %228 = arith.subf %221, %227 : vector<8x128xf32>
    %229 = arith.select %223, %226, %228 : vector<8x128xi1>, vector<8x128xf32>
    %230 = arith.addf %219, %229 : vector<8x128xf32>
    %231 = arith.subf %204, %208 : vector<8x128xf32>
    %232 = math.absf %231 : vector<8x128xf32>
    %cst_177 = arith.constant 1.000000e+00 : f32
    %233 = vector.broadcast %cst_177 : f32 to vector<8x128xf32>
    %234 = arith.cmpf olt, %232, %233 : vector<8x128xf32>
    %cst_178 = arith.constant 5.000000e-01 : f32
    %235 = vector.broadcast %cst_178 : f32 to vector<8x128xf32>
    %236 = arith.mulf %235, %232 : vector<8x128xf32>
    %237 = arith.mulf %236, %232 : vector<8x128xf32>
    %cst_179 = arith.constant 5.000000e-01 : f32
    %238 = vector.broadcast %cst_179 : f32 to vector<8x128xf32>
    %239 = arith.subf %232, %238 : vector<8x128xf32>
    %240 = arith.select %234, %237, %239 : vector<8x128xi1>, vector<8x128xf32>
    %241 = arith.addf %230, %240 : vector<8x128xf32>
    %242 = arith.subf %205, %209 : vector<8x128xf32>
    %243 = math.absf %242 : vector<8x128xf32>
    %cst_180 = arith.constant 1.000000e+00 : f32
    %244 = vector.broadcast %cst_180 : f32 to vector<8x128xf32>
    %245 = arith.cmpf olt, %243, %244 : vector<8x128xf32>
    %cst_181 = arith.constant 5.000000e-01 : f32
    %246 = vector.broadcast %cst_181 : f32 to vector<8x128xf32>
    %247 = arith.mulf %246, %243 : vector<8x128xf32>
    %248 = arith.mulf %247, %243 : vector<8x128xf32>
    %cst_182 = arith.constant 5.000000e-01 : f32
    %249 = vector.broadcast %cst_182 : f32 to vector<8x128xf32>
    %250 = arith.subf %243, %249 : vector<8x128xf32>
    %251 = arith.select %245, %248, %250 : vector<8x128xi1>, vector<8x128xf32>
    %252 = arith.addf %241, %251 : vector<8x128xf32>
    %253 = arith.subf %204, %206 : vector<8x128xf32>
    %254 = math.absf %253 : vector<8x128xf32>
    %cst_183 = arith.constant 1.000000e+00 : f32
    %255 = vector.broadcast %cst_183 : f32 to vector<8x128xf32>
    %256 = arith.cmpf olt, %254, %255 : vector<8x128xf32>
    %cst_184 = arith.constant 5.000000e-01 : f32
    %257 = vector.broadcast %cst_184 : f32 to vector<8x128xf32>
    %258 = arith.mulf %257, %254 : vector<8x128xf32>
    %259 = arith.mulf %258, %254 : vector<8x128xf32>
    %cst_185 = arith.constant 5.000000e-01 : f32
    %260 = vector.broadcast %cst_185 : f32 to vector<8x128xf32>
    %261 = arith.subf %254, %260 : vector<8x128xf32>
    %262 = arith.select %256, %259, %261 : vector<8x128xi1>, vector<8x128xf32>
    %263 = arith.subf %205, %207 : vector<8x128xf32>
    %264 = math.absf %263 : vector<8x128xf32>
    %cst_186 = arith.constant 1.000000e+00 : f32
    %265 = vector.broadcast %cst_186 : f32 to vector<8x128xf32>
    %266 = arith.cmpf olt, %264, %265 : vector<8x128xf32>
    %cst_187 = arith.constant 5.000000e-01 : f32
    %267 = vector.broadcast %cst_187 : f32 to vector<8x128xf32>
    %268 = arith.mulf %267, %264 : vector<8x128xf32>
    %269 = arith.mulf %268, %264 : vector<8x128xf32>
    %cst_188 = arith.constant 5.000000e-01 : f32
    %270 = vector.broadcast %cst_188 : f32 to vector<8x128xf32>
    %271 = arith.subf %264, %270 : vector<8x128xf32>
    %272 = arith.select %266, %269, %271 : vector<8x128xi1>, vector<8x128xf32>
    %273 = arith.addf %262, %272 : vector<8x128xf32>
    %274 = arith.subf %202, %208 : vector<8x128xf32>
    %275 = math.absf %274 : vector<8x128xf32>
    %cst_189 = arith.constant 1.000000e+00 : f32
    %276 = vector.broadcast %cst_189 : f32 to vector<8x128xf32>
    %277 = arith.cmpf olt, %275, %276 : vector<8x128xf32>
    %cst_190 = arith.constant 5.000000e-01 : f32
    %278 = vector.broadcast %cst_190 : f32 to vector<8x128xf32>
    %279 = arith.mulf %278, %275 : vector<8x128xf32>
    %280 = arith.mulf %279, %275 : vector<8x128xf32>
    %cst_191 = arith.constant 5.000000e-01 : f32
    %281 = vector.broadcast %cst_191 : f32 to vector<8x128xf32>
    %282 = arith.subf %275, %281 : vector<8x128xf32>
    %283 = arith.select %277, %280, %282 : vector<8x128xi1>, vector<8x128xf32>
    %284 = arith.addf %273, %283 : vector<8x128xf32>
    %285 = arith.subf %203, %209 : vector<8x128xf32>
    %286 = math.absf %285 : vector<8x128xf32>
    %cst_192 = arith.constant 1.000000e+00 : f32
    %287 = vector.broadcast %cst_192 : f32 to vector<8x128xf32>
    %288 = arith.cmpf olt, %286, %287 : vector<8x128xf32>
    %cst_193 = arith.constant 5.000000e-01 : f32
    %289 = vector.broadcast %cst_193 : f32 to vector<8x128xf32>
    %290 = arith.mulf %289, %286 : vector<8x128xf32>
    %291 = arith.mulf %290, %286 : vector<8x128xf32>
    %cst_194 = arith.constant 5.000000e-01 : f32
    %292 = vector.broadcast %cst_194 : f32 to vector<8x128xf32>
    %293 = arith.subf %286, %292 : vector<8x128xf32>
    %294 = arith.select %288, %291, %293 : vector<8x128xi1>, vector<8x128xf32>
    %295 = arith.addf %284, %294 : vector<8x128xf32>
    %c0_195 = arith.constant 0 : index
    %c12 = arith.constant 12 : index
    %c0_196 = arith.constant 0 : index
    %c0_197 = arith.constant 0 : index
    %296 = vector.load %arg4[%c0_195, %c12, %c0_196, %c0_197] : memref<1x22x8x128xf32, #tpu.memory_space<vmem>>, vector<1x1x8x128xf32>
    %297 = vector.shape_cast %296 : vector<1x1x8x128xf32> to vector<8x128xf32>
    %298 = vector.shape_cast %201 : vector<8x128xf32> to vector<1x8x128xf32>
    %cst_198 = arith.constant dense<0.000000e+00> : vector<8x128xf32>
    %299 = vector.multi_reduction <add>, %298, %cst_198 [0] : vector<1x8x128xf32> to vector<8x128xf32>
    %300 = arith.addf %297, %299 : vector<8x128xf32>
    %c0_199 = arith.constant 0 : index
    %c12_200 = arith.constant 12 : index
    %c0_201 = arith.constant 0 : index
    %c0_202 = arith.constant 0 : index
    %301 = vector.load %arg4[%c0_199, %c12_200, %c0_201, %c0_202] : memref<1x22x8x128xf32, #tpu.memory_space<vmem>>, vector<1x1x8x128xf32>
    %302 = vector.shape_cast %301 : vector<1x1x8x128xf32> to vector<8x128xf32>
    %303 = vector.shape_cast %300 : vector<8x128xf32> to vector<1x1x8x128xf32>
    tpu.vector_store %arg4[%c0_199, %c12_200, %c0_201, %c0_202], %303 {strides = array<i32>} : memref<1x22x8x128xf32, #tpu.memory_space<vmem>>, vector<1x1x8x128xf32>,
    %c0_203 = arith.constant 0 : index
    %c13 = arith.constant 13 : index
    %c0_204 = arith.constant 0 : index
    %c0_205 = arith.constant 0 : index
    %304 = vector.load %arg4[%c0_203, %c13, %c0_204, %c0_205] : memref<1x22x8x128xf32, #tpu.memory_space<vmem>>, vector<1x1x8x128xf32>
    %305 = vector.shape_cast %304 : vector<1x1x8x128xf32> to vector<8x128xf32>
    %306 = arith.minimumf %252, %295 : vector<8x128xf32>
    %307 = vector.shape_cast %306 : vector<8x128xf32> to vector<1x8x128xf32>
    %cst_206 = arith.constant dense<0.000000e+00> : vector<8x128xf32>
    %308 = vector.multi_reduction <add>, %307, %cst_206 [0] : vector<1x8x128xf32> to vector<8x128xf32>
    %309 = arith.addf %305, %308 : vector<8x128xf32>
    %c0_207 = arith.constant 0 : index
    %c13_208 = arith.constant 13 : index
    %c0_209 = arith.constant 0 : index
    %c0_210 = arith.constant 0 : index
    %310 = vector.load %arg4[%c0_207, %c13_208, %c0_209, %c0_210] : memref<1x22x8x128xf32, #tpu.memory_space<vmem>>, vector<1x1x8x128xf32>
    %311 = vector.shape_cast %310 : vector<1x1x8x128xf32> to vector<8x128xf32>
    %312 = vector.shape_cast %309 : vector<8x128xf32> to vector<1x1x8x128xf32>
    tpu.vector_store %arg4[%c0_207, %c13_208, %c0_209, %c0_210], %312 {strides = array<i32>} : memref<1x22x8x128xf32, #tpu.memory_space<vmem>>, vector<1x1x8x128xf32>,
    %c0_211 = arith.constant 0 : index
    %c8_212 = arith.constant 8 : index
    %c0_213 = arith.constant 0 : index
    %c0_214 = arith.constant 0 : index
    %313 = vector.load %arg3[%c0_211, %c8_212, %c0_213, %c0_214] : memref<1x16x8x128xf32, #tpu.memory_space<vmem>>, vector<1x1x8x128xf32>
    %314 = vector.shape_cast %313 : vector<1x1x8x128xf32> to vector<8x128xf32>
    %c0_215 = arith.constant 0 : index
    %c9_216 = arith.constant 9 : index
    %c0_217 = arith.constant 0 : index
    %c0_218 = arith.constant 0 : index
    %315 = vector.load %arg3[%c0_215, %c9_216, %c0_217, %c0_218] : memref<1x16x8x128xf32, #tpu.memory_space<vmem>>, vector<1x1x8x128xf32>
    %316 = vector.shape_cast %315 : vector<1x1x8x128xf32> to vector<8x128xf32>
    %c0_219 = arith.constant 0 : index
    %c10_220 = arith.constant 10 : index
    %c0_221 = arith.constant 0 : index
    %c0_222 = arith.constant 0 : index
    %317 = vector.load %arg3[%c0_219, %c10_220, %c0_221, %c0_222] : memref<1x16x8x128xf32, #tpu.memory_space<vmem>>, vector<1x1x8x128xf32>
    %318 = vector.shape_cast %317 : vector<1x1x8x128xf32> to vector<8x128xf32>
    %c0_223 = arith.constant 0 : index
    %c11_224 = arith.constant 11 : index
    %c0_225 = arith.constant 0 : index
    %c0_226 = arith.constant 0 : index
    %319 = vector.load %arg3[%c0_223, %c11_224, %c0_225, %c0_226] : memref<1x16x8x128xf32, #tpu.memory_space<vmem>>, vector<1x1x8x128xf32>
    %320 = vector.shape_cast %319 : vector<1x1x8x128xf32> to vector<8x128xf32>
    %c0_227 = arith.constant 0 : index
    %c8_228 = arith.constant 8 : index
    %c0_229 = arith.constant 0 : index
    %c0_230 = arith.constant 0 : index
    %321 = vector.load %arg2[%c0_227, %c8_228, %c0_229, %c0_230] : memref<1x16x8x128xf32, #tpu.memory_space<vmem>>, vector<1x1x8x128xf32>
    %322 = vector.shape_cast %321 : vector<1x1x8x128xf32> to vector<8x128xf32>
    %c0_231 = arith.constant 0 : index
    %c9_232 = arith.constant 9 : index
    %c0_233 = arith.constant 0 : index
    %c0_234 = arith.constant 0 : index
    %323 = vector.load %arg2[%c0_231, %c9_232, %c0_233, %c0_234] : memref<1x16x8x128xf32, #tpu.memory_space<vmem>>, vector<1x1x8x128xf32>
    %324 = vector.shape_cast %323 : vector<1x1x8x128xf32> to vector<8x128xf32>
    %c0_235 = arith.constant 0 : index
    %c10_236 = arith.constant 10 : index
    %c0_237 = arith.constant 0 : index
    %c0_238 = arith.constant 0 : index
    %325 = vector.load %arg2[%c0_235, %c10_236, %c0_237, %c0_238] : memref<1x16x8x128xf32, #tpu.memory_space<vmem>>, vector<1x1x8x128xf32>
    %326 = vector.shape_cast %325 : vector<1x1x8x128xf32> to vector<8x128xf32>
    %c0_239 = arith.constant 0 : index
    %c11_240 = arith.constant 11 : index
    %c0_241 = arith.constant 0 : index
    %c0_242 = arith.constant 0 : index
    %327 = vector.load %arg2[%c0_239, %c11_240, %c0_241, %c0_242] : memref<1x16x8x128xf32, #tpu.memory_space<vmem>>, vector<1x1x8x128xf32>
    %328 = vector.shape_cast %327 : vector<1x1x8x128xf32> to vector<8x128xf32>
    %329 = math.absf %314 : vector<8x128xf32>
    %330 = math.absf %316 : vector<8x128xf32>
    %331 = arith.addf %329, %330 : vector<8x128xf32>
    %332 = math.absf %318 : vector<8x128xf32>
    %333 = arith.addf %331, %332 : vector<8x128xf32>
    %334 = math.absf %320 : vector<8x128xf32>
    %335 = arith.addf %333, %334 : vector<8x128xf32>
    %cst_243 = arith.constant 0.000000e+00 : f32
    %336 = vector.broadcast %cst_243 : f32 to vector<8x128xf32>
    %337 = arith.cmpf one, %335, %336 : vector<8x128xf32>
    %338 = arith.extui %337 : vector<8x128xi1> to vector<8x128xi32>
    %339 = arith.sitofp %338 : vector<8x128xi32> to vector<8x128xf32>
    %340 = arith.mulf %322, %339 : vector<8x128xf32>
    %341 = arith.mulf %324, %339 : vector<8x128xf32>
    %342 = arith.mulf %326, %339 : vector<8x128xf32>
    %343 = arith.mulf %328, %339 : vector<8x128xf32>
    %344 = arith.mulf %314, %339 : vector<8x128xf32>
    %345 = arith.mulf %316, %339 : vector<8x128xf32>
    %346 = arith.mulf %318, %339 : vector<8x128xf32>
    %347 = arith.mulf %320, %339 : vector<8x128xf32>
    %348 = arith.subf %340, %344 : vector<8x128xf32>
    %349 = math.absf %348 : vector<8x128xf32>
    %cst_244 = arith.constant 1.000000e+00 : f32
    %350 = vector.broadcast %cst_244 : f32 to vector<8x128xf32>
    %351 = arith.cmpf olt, %349, %350 : vector<8x128xf32>
    %cst_245 = arith.constant 5.000000e-01 : f32
    %352 = vector.broadcast %cst_245 : f32 to vector<8x128xf32>
    %353 = arith.mulf %352, %349 : vector<8x128xf32>
    %354 = arith.mulf %353, %349 : vector<8x128xf32>
    %cst_246 = arith.constant 5.000000e-01 : f32
    %355 = vector.broadcast %cst_246 : f32 to vector<8x128xf32>
    %356 = arith.subf %349, %355 : vector<8x128xf32>
    %357 = arith.select %351, %354, %356 : vector<8x128xi1>, vector<8x128xf32>
    %358 = arith.subf %341, %345 : vector<8x128xf32>
    %359 = math.absf %358 : vector<8x128xf32>
    %cst_247 = arith.constant 1.000000e+00 : f32
    %360 = vector.broadcast %cst_247 : f32 to vector<8x128xf32>
    %361 = arith.cmpf olt, %359, %360 : vector<8x128xf32>
    %cst_248 = arith.constant 5.000000e-01 : f32
    %362 = vector.broadcast %cst_248 : f32 to vector<8x128xf32>
    %363 = arith.mulf %362, %359 : vector<8x128xf32>
    %364 = arith.mulf %363, %359 : vector<8x128xf32>
    %cst_249 = arith.constant 5.000000e-01 : f32
    %365 = vector.broadcast %cst_249 : f32 to vector<8x128xf32>
    %366 = arith.subf %359, %365 : vector<8x128xf32>
    %367 = arith.select %361, %364, %366 : vector<8x128xi1>, vector<8x128xf32>
    %368 = arith.addf %357, %367 : vector<8x128xf32>
    %369 = arith.subf %342, %346 : vector<8x128xf32>
    %370 = math.absf %369 : vector<8x128xf32>
    %cst_250 = arith.constant 1.000000e+00 : f32
    %371 = vector.broadcast %cst_250 : f32 to vector<8x128xf32>
    %372 = arith.cmpf olt, %370, %371 : vector<8x128xf32>
    %cst_251 = arith.constant 5.000000e-01 : f32
    %373 = vector.broadcast %cst_251 : f32 to vector<8x128xf32>
    %374 = arith.mulf %373, %370 : vector<8x128xf32>
    %375 = arith.mulf %374, %370 : vector<8x128xf32>
    %cst_252 = arith.constant 5.000000e-01 : f32
    %376 = vector.broadcast %cst_252 : f32 to vector<8x128xf32>
    %377 = arith.subf %370, %376 : vector<8x128xf32>
    %378 = arith.select %372, %375, %377 : vector<8x128xi1>, vector<8x128xf32>
    %379 = arith.addf %368, %378 : vector<8x128xf32>
    %380 = arith.subf %343, %347 : vector<8x128xf32>
    %381 = math.absf %380 : vector<8x128xf32>
    %cst_253 = arith.constant 1.000000e+00 : f32
    %382 = vector.broadcast %cst_253 : f32 to vector<8x128xf32>
    %383 = arith.cmpf olt, %381, %382 : vector<8x128xf32>
    %cst_254 = arith.constant 5.000000e-01 : f32
    %384 = vector.broadcast %cst_254 : f32 to vector<8x128xf32>
    %385 = arith.mulf %384, %381 : vector<8x128xf32>
    %386 = arith.mulf %385, %381 : vector<8x128xf32>
    %cst_255 = arith.constant 5.000000e-01 : f32
    %387 = vector.broadcast %cst_255 : f32 to vector<8x128xf32>
    %388 = arith.subf %381, %387 : vector<8x128xf32>
    %389 = arith.select %383, %386, %388 : vector<8x128xi1>, vector<8x128xf32>
    %390 = arith.addf %379, %389 : vector<8x128xf32>
    %391 = arith.subf %342, %344 : vector<8x128xf32>
    %392 = math.absf %391 : vector<8x128xf32>
    %cst_256 = arith.constant 1.000000e+00 : f32
    %393 = vector.broadcast %cst_256 : f32 to vector<8x128xf32>
    %394 = arith.cmpf olt, %392, %393 : vector<8x128xf32>
    %cst_257 = arith.constant 5.000000e-01 : f32
    %395 = vector.broadcast %cst_257 : f32 to vector<8x128xf32>
    %396 = arith.mulf %395, %392 : vector<8x128xf32>
    %397 = arith.mulf %396, %392 : vector<8x128xf32>
    %cst_258 = arith.constant 5.000000e-01 : f32
    %398 = vector.broadcast %cst_258 : f32 to vector<8x128xf32>
    %399 = arith.subf %392, %398 : vector<8x128xf32>
    %400 = arith.select %394, %397, %399 : vector<8x128xi1>, vector<8x128xf32>
    %401 = arith.subf %343, %345 : vector<8x128xf32>
    %402 = math.absf %401 : vector<8x128xf32>
    %cst_259 = arith.constant 1.000000e+00 : f32
    %403 = vector.broadcast %cst_259 : f32 to vector<8x128xf32>
    %404 = arith.cmpf olt, %402, %403 : vector<8x128xf32>
    %cst_260 = arith.constant 5.000000e-01 : f32
    %405 = vector.broadcast %cst_260 : f32 to vector<8x128xf32>
    %406 = arith.mulf %405, %402 : vector<8x128xf32>
    %407 = arith.mulf %406, %402 : vector<8x128xf32>
    %cst_261 = arith.constant 5.000000e-01 : f32
    %408 = vector.broadcast %cst_261 : f32 to vector<8x128xf32>
    %409 = arith.subf %402, %408 : vector<8x128xf32>
    %410 = arith.select %404, %407, %409 : vector<8x128xi1>, vector<8x128xf32>
    %411 = arith.addf %400, %410 : vector<8x128xf32>
    %412 = arith.subf %340, %346 : vector<8x128xf32>
    %413 = math.absf %412 : vector<8x128xf32>
    %cst_262 = arith.constant 1.000000e+00 : f32
    %414 = vector.broadcast %cst_262 : f32 to vector<8x128xf32>
    %415 = arith.cmpf olt, %413, %414 : vector<8x128xf32>
    %cst_263 = arith.constant 5.000000e-01 : f32
    %416 = vector.broadcast %cst_263 : f32 to vector<8x128xf32>
    %417 = arith.mulf %416, %413 : vector<8x128xf32>
    %418 = arith.mulf %417, %413 : vector<8x128xf32>
    %cst_264 = arith.constant 5.000000e-01 : f32
    %419 = vector.broadcast %cst_264 : f32 to vector<8x128xf32>
    %420 = arith.subf %413, %419 : vector<8x128xf32>
    %421 = arith.select %415, %418, %420 : vector<8x128xi1>, vector<8x128xf32>
    %422 = arith.addf %411, %421 : vector<8x128xf32>
    %423 = arith.subf %341, %347 : vector<8x128xf32>
    %424 = math.absf %423 : vector<8x128xf32>
    %cst_265 = arith.constant 1.000000e+00 : f32
    %425 = vector.broadcast %cst_265 : f32 to vector<8x128xf32>
    %426 = arith.cmpf olt, %424, %425 : vector<8x128xf32>
    %cst_266 = arith.constant 5.000000e-01 : f32
    %427 = vector.broadcast %cst_266 : f32 to vector<8x128xf32>
    %428 = arith.mulf %427, %424 : vector<8x128xf32>
    %429 = arith.mulf %428, %424 : vector<8x128xf32>
    %cst_267 = arith.constant 5.000000e-01 : f32
    %430 = vector.broadcast %cst_267 : f32 to vector<8x128xf32>
    %431 = arith.subf %424, %430 : vector<8x128xf32>
    %432 = arith.select %426, %429, %431 : vector<8x128xi1>, vector<8x128xf32>
    %433 = arith.addf %422, %432 : vector<8x128xf32>
    %c0_268 = arith.constant 0 : index
    %c14_269 = arith.constant 14 : index
    %c0_270 = arith.constant 0 : index
    %c0_271 = arith.constant 0 : index
    %434 = vector.load %arg4[%c0_268, %c14_269, %c0_270, %c0_271] : memref<1x22x8x128xf32, #tpu.memory_space<vmem>>, vector<1x1x8x128xf32>
    %435 = vector.shape_cast %434 : vector<1x1x8x128xf32> to vector<8x128xf32>
    %436 = vector.shape_cast %339 : vector<8x128xf32> to vector<1x8x128xf32>
    %cst_272 = arith.constant dense<0.000000e+00> : vector<8x128xf32>
    %437 = vector.multi_reduction <add>, %436, %cst_272 [0] : vector<1x8x128xf32> to vector<8x128xf32>
    %438 = arith.addf %435, %437 : vector<8x128xf32>
    %c0_273 = arith.constant 0 : index
    %c14_274 = arith.constant 14 : index
    %c0_275 = arith.constant 0 : index
    %c0_276 = arith.constant 0 : index
    %439 = vector.load %arg4[%c0_273, %c14_274, %c0_275, %c0_276] : memref<1x22x8x128xf32, #tpu.memory_space<vmem>>, vector<1x1x8x128xf32>
    %440 = vector.shape_cast %439 : vector<1x1x8x128xf32> to vector<8x128xf32>
    %441 = vector.shape_cast %438 : vector<8x128xf32> to vector<1x1x8x128xf32>
    tpu.vector_store %arg4[%c0_273, %c14_274, %c0_275, %c0_276], %441 {strides = array<i32>} : memref<1x22x8x128xf32, #tpu.memory_space<vmem>>, vector<1x1x8x128xf32>,
    %c0_277 = arith.constant 0 : index
    %c15_278 = arith.constant 15 : index
    %c0_279 = arith.constant 0 : index
    %c0_280 = arith.constant 0 : index
    %442 = vector.load %arg4[%c0_277, %c15_278, %c0_279, %c0_280] : memref<1x22x8x128xf32, #tpu.memory_space<vmem>>, vector<1x1x8x128xf32>
    %443 = vector.shape_cast %442 : vector<1x1x8x128xf32> to vector<8x128xf32>
    %444 = arith.minimumf %390, %433 : vector<8x128xf32>
    %445 = vector.shape_cast %444 : vector<8x128xf32> to vector<1x8x128xf32>
    %cst_281 = arith.constant dense<0.000000e+00> : vector<8x128xf32>
    %446 = vector.multi_reduction <add>, %445, %cst_281 [0] : vector<1x8x128xf32> to vector<8x128xf32>
    %447 = arith.addf %443, %446 : vector<8x128xf32>
    %c0_282 = arith.constant 0 : index
    %c15_283 = arith.constant 15 : index
    %c0_284 = arith.constant 0 : index
    %c0_285 = arith.constant 0 : index
    %448 = vector.load %arg4[%c0_282, %c15_283, %c0_284, %c0_285] : memref<1x22x8x128xf32, #tpu.memory_space<vmem>>, vector<1x1x8x128xf32>
    %449 = vector.shape_cast %448 : vector<1x1x8x128xf32> to vector<8x128xf32>
    %450 = vector.shape_cast %447 : vector<8x128xf32> to vector<1x1x8x128xf32>
    tpu.vector_store %arg4[%c0_282, %c15_283, %c0_284, %c0_285], %450 {strides = array<i32>} : memref<1x22x8x128xf32, #tpu.memory_space<vmem>>, vector<1x1x8x128xf32>,
    %c0_286 = arith.constant 0 : index
    %c5_287 = arith.constant 5 : index
    %c0_288 = arith.constant 0 : index
    %c0_289 = arith.constant 0 : index
    %451 = vector.load %arg3[%c0_286, %c5_287, %c0_288, %c0_289] : memref<1x16x8x128xf32, #tpu.memory_space<vmem>>, vector<1x1x8x128xf32>
    %452 = vector.shape_cast %451 : vector<1x1x8x128xf32> to vector<8x128xf32>
    %c0_290 = arith.constant 0 : index
    %c6_291 = arith.constant 6 : index
    %c0_292 = arith.constant 0 : index
    %c0_293 = arith.constant 0 : index
    %453 = vector.load %arg3[%c0_290, %c6_291, %c0_292, %c0_293] : memref<1x16x8x128xf32, #tpu.memory_space<vmem>>, vector<1x1x8x128xf32>
    %454 = vector.shape_cast %453 : vector<1x1x8x128xf32> to vector<8x128xf32>
    %c0_294 = arith.constant 0 : index
    %c5_295 = arith.constant 5 : index
    %c0_296 = arith.constant 0 : index
    %c0_297 = arith.constant 0 : index
    %455 = vector.load %arg2[%c0_294, %c5_295, %c0_296, %c0_297] : memref<1x16x8x128xf32, #tpu.memory_space<vmem>>, vector<1x1x8x128xf32>
    %456 = vector.shape_cast %455 : vector<1x1x8x128xf32> to vector<8x128xf32>
    %457 = arith.negf %456 : vector<8x128xf32>
    %458 = math.exp %457 : vector<8x128xf32>
    %cst_298 = arith.constant 1.000000e+00 : f32
    %459 = vector.broadcast %cst_298 : f32 to vector<8x128xf32>
    %460 = arith.addf %459, %458 : vector<8x128xf32>
    %461 = arith.divf %459, %460 : vector<8x128xf32>
    %c0_299 = arith.constant 0 : index
    %c6_300 = arith.constant 6 : index
    %c0_301 = arith.constant 0 : index
    %c0_302 = arith.constant 0 : index
    %462 = vector.load %arg2[%c0_299, %c6_300, %c0_301, %c0_302] : memref<1x16x8x128xf32, #tpu.memory_space<vmem>>, vector<1x1x8x128xf32>
    %463 = vector.shape_cast %462 : vector<1x1x8x128xf32> to vector<8x128xf32>
    %464 = arith.negf %463 : vector<8x128xf32>
    %465 = math.exp %464 : vector<8x128xf32>
    %cst_303 = arith.constant 1.000000e+00 : f32
    %466 = vector.broadcast %cst_303 : f32 to vector<8x128xf32>
    %467 = arith.addf %466, %465 : vector<8x128xf32>
    %468 = arith.divf %466, %467 : vector<8x128xf32>
    %cst_304 = arith.constant 0.000000e+00 : f32
    %469 = vector.broadcast %cst_304 : f32 to vector<8x128xf32>
    %470 = arith.cmpf one, %452, %469 : vector<8x128xf32>
    %471 = arith.extui %470 : vector<8x128xi1> to vector<8x128xi32>
    %472 = arith.sitofp %471 : vector<8x128xi32> to vector<8x128xf32>
    %c0_305 = arith.constant 0 : index
    %c16 = arith.constant 16 : index
    %c0_306 = arith.constant 0 : index
    %c0_307 = arith.constant 0 : index
    %473 = vector.load %arg4[%c0_305, %c16, %c0_306, %c0_307] : memref<1x22x8x128xf32, #tpu.memory_space<vmem>>, vector<1x1x8x128xf32>
    %474 = vector.shape_cast %473 : vector<1x1x8x128xf32> to vector<8x128xf32>
    %475 = vector.shape_cast %472 : vector<8x128xf32> to vector<1x8x128xf32>
    %cst_308 = arith.constant dense<0.000000e+00> : vector<8x128xf32>
    %476 = vector.multi_reduction <add>, %475, %cst_308 [0] : vector<1x8x128xf32> to vector<8x128xf32>
    %477 = arith.addf %474, %476 : vector<8x128xf32>
    %c0_309 = arith.constant 0 : index
    %c16_310 = arith.constant 16 : index
    %c0_311 = arith.constant 0 : index
    %c0_312 = arith.constant 0 : index
    %478 = vector.load %arg4[%c0_309, %c16_310, %c0_311, %c0_312] : memref<1x22x8x128xf32, #tpu.memory_space<vmem>>, vector<1x1x8x128xf32>
    %479 = vector.shape_cast %478 : vector<1x1x8x128xf32> to vector<8x128xf32>
    %480 = vector.shape_cast %477 : vector<8x128xf32> to vector<1x1x8x128xf32>
    tpu.vector_store %arg4[%c0_309, %c16_310, %c0_311, %c0_312], %480 {strides = array<i32>} : memref<1x22x8x128xf32, #tpu.memory_space<vmem>>, vector<1x1x8x128xf32>,
    %c0_313 = arith.constant 0 : index
    %c17 = arith.constant 17 : index
    %c0_314 = arith.constant 0 : index
    %c0_315 = arith.constant 0 : index
    %481 = vector.load %arg4[%c0_313, %c17, %c0_314, %c0_315] : memref<1x22x8x128xf32, #tpu.memory_space<vmem>>, vector<1x1x8x128xf32>
    %482 = vector.shape_cast %481 : vector<1x1x8x128xf32> to vector<8x128xf32>
    %483 = arith.subf %461, %452 : vector<8x128xf32>
    %484 = math.absf %483 : vector<8x128xf32>
    %cst_316 = arith.constant 1.000000e+00 : f32
    %485 = vector.broadcast %cst_316 : f32 to vector<8x128xf32>
    %486 = arith.cmpf olt, %484, %485 : vector<8x128xf32>
    %cst_317 = arith.constant 5.000000e-01 : f32
    %487 = vector.broadcast %cst_317 : f32 to vector<8x128xf32>
    %488 = arith.mulf %487, %484 : vector<8x128xf32>
    %489 = arith.mulf %488, %484 : vector<8x128xf32>
    %cst_318 = arith.constant 5.000000e-01 : f32
    %490 = vector.broadcast %cst_318 : f32 to vector<8x128xf32>
    %491 = arith.subf %484, %490 : vector<8x128xf32>
    %492 = arith.select %486, %489, %491 : vector<8x128xi1>, vector<8x128xf32>
    %493 = arith.mulf %492, %472 : vector<8x128xf32>
    %494 = vector.shape_cast %493 : vector<8x128xf32> to vector<1x8x128xf32>
    %cst_319 = arith.constant dense<0.000000e+00> : vector<8x128xf32>
    %495 = vector.multi_reduction <add>, %494, %cst_319 [0] : vector<1x8x128xf32> to vector<8x128xf32>
    %496 = arith.addf %482, %495 : vector<8x128xf32>
    %c0_320 = arith.constant 0 : index
    %c17_321 = arith.constant 17 : index
    %c0_322 = arith.constant 0 : index
    %c0_323 = arith.constant 0 : index
    %497 = vector.load %arg4[%c0_320, %c17_321, %c0_322, %c0_323] : memref<1x22x8x128xf32, #tpu.memory_space<vmem>>, vector<1x1x8x128xf32>
    %498 = vector.shape_cast %497 : vector<1x1x8x128xf32> to vector<8x128xf32>
    %499 = vector.shape_cast %496 : vector<8x128xf32> to vector<1x1x8x128xf32>
    tpu.vector_store %arg4[%c0_320, %c17_321, %c0_322, %c0_323], %499 {strides = array<i32>} : memref<1x22x8x128xf32, #tpu.memory_space<vmem>>, vector<1x1x8x128xf32>,
    %c0_324 = arith.constant 0 : index
    %c18 = arith.constant 18 : index
    %c0_325 = arith.constant 0 : index
    %c0_326 = arith.constant 0 : index
    %500 = vector.load %arg4[%c0_324, %c18, %c0_325, %c0_326] : memref<1x22x8x128xf32, #tpu.memory_space<vmem>>, vector<1x1x8x128xf32>
    %501 = vector.shape_cast %500 : vector<1x1x8x128xf32> to vector<8x128xf32>
    %502 = arith.subf %468, %454 : vector<8x128xf32>
    %503 = math.absf %502 : vector<8x128xf32>
    %cst_327 = arith.constant 1.000000e+00 : f32
    %504 = vector.broadcast %cst_327 : f32 to vector<8x128xf32>
    %505 = arith.cmpf olt, %503, %504 : vector<8x128xf32>
    %cst_328 = arith.constant 5.000000e-01 : f32
    %506 = vector.broadcast %cst_328 : f32 to vector<8x128xf32>
    %507 = arith.mulf %506, %503 : vector<8x128xf32>
    %508 = arith.mulf %507, %503 : vector<8x128xf32>
    %cst_329 = arith.constant 5.000000e-01 : f32
    %509 = vector.broadcast %cst_329 : f32 to vector<8x128xf32>
    %510 = arith.subf %503, %509 : vector<8x128xf32>
    %511 = arith.select %505, %508, %510 : vector<8x128xi1>, vector<8x128xf32>
    %512 = arith.mulf %511, %472 : vector<8x128xf32>
    %513 = vector.shape_cast %512 : vector<8x128xf32> to vector<1x8x128xf32>
    %cst_330 = arith.constant dense<0.000000e+00> : vector<8x128xf32>
    %514 = vector.multi_reduction <add>, %513, %cst_330 [0] : vector<1x8x128xf32> to vector<8x128xf32>
    %515 = arith.addf %501, %514 : vector<8x128xf32>
    %c0_331 = arith.constant 0 : index
    %c18_332 = arith.constant 18 : index
    %c0_333 = arith.constant 0 : index
    %c0_334 = arith.constant 0 : index
    %516 = vector.load %arg4[%c0_331, %c18_332, %c0_333, %c0_334] : memref<1x22x8x128xf32, #tpu.memory_space<vmem>>, vector<1x1x8x128xf32>
    %517 = vector.shape_cast %516 : vector<1x1x8x128xf32> to vector<8x128xf32>
    %518 = vector.shape_cast %515 : vector<8x128xf32> to vector<1x1x8x128xf32>
    tpu.vector_store %arg4[%c0_331, %c18_332, %c0_333, %c0_334], %518 {strides = array<i32>} : memref<1x22x8x128xf32, #tpu.memory_space<vmem>>, vector<1x1x8x128xf32>,
    %c0_335 = arith.constant 0 : index
    %c12_336 = arith.constant 12 : index
    %c0_337 = arith.constant 0 : index
    %c0_338 = arith.constant 0 : index
    %519 = vector.load %arg3[%c0_335, %c12_336, %c0_337, %c0_338] : memref<1x16x8x128xf32, #tpu.memory_space<vmem>>, vector<1x1x8x128xf32>
    %520 = vector.shape_cast %519 : vector<1x1x8x128xf32> to vector<8x128xf32>
    %c0_339 = arith.constant 0 : index
    %c13_340 = arith.constant 13 : index
    %c0_341 = arith.constant 0 : index
    %c0_342 = arith.constant 0 : index
    %521 = vector.load %arg3[%c0_339, %c13_340, %c0_341, %c0_342] : memref<1x16x8x128xf32, #tpu.memory_space<vmem>>, vector<1x1x8x128xf32>
    %522 = vector.shape_cast %521 : vector<1x1x8x128xf32> to vector<8x128xf32>
    %c0_343 = arith.constant 0 : index
    %c12_344 = arith.constant 12 : index
    %c0_345 = arith.constant 0 : index
    %c0_346 = arith.constant 0 : index
    %523 = vector.load %arg2[%c0_343, %c12_344, %c0_345, %c0_346] : memref<1x16x8x128xf32, #tpu.memory_space<vmem>>, vector<1x1x8x128xf32>
    %524 = vector.shape_cast %523 : vector<1x1x8x128xf32> to vector<8x128xf32>
    %525 = arith.negf %524 : vector<8x128xf32>
    %526 = math.exp %525 : vector<8x128xf32>
    %cst_347 = arith.constant 1.000000e+00 : f32
    %527 = vector.broadcast %cst_347 : f32 to vector<8x128xf32>
    %528 = arith.addf %527, %526 : vector<8x128xf32>
    %529 = arith.divf %527, %528 : vector<8x128xf32>
    %c0_348 = arith.constant 0 : index
    %c13_349 = arith.constant 13 : index
    %c0_350 = arith.constant 0 : index
    %c0_351 = arith.constant 0 : index
    %530 = vector.load %arg2[%c0_348, %c13_349, %c0_350, %c0_351] : memref<1x16x8x128xf32, #tpu.memory_space<vmem>>, vector<1x1x8x128xf32>
    %531 = vector.shape_cast %530 : vector<1x1x8x128xf32> to vector<8x128xf32>
    %532 = arith.negf %531 : vector<8x128xf32>
    %533 = math.exp %532 : vector<8x128xf32>
    %cst_352 = arith.constant 1.000000e+00 : f32
    %534 = vector.broadcast %cst_352 : f32 to vector<8x128xf32>
    %535 = arith.addf %534, %533 : vector<8x128xf32>
    %536 = arith.divf %534, %535 : vector<8x128xf32>
    %cst_353 = arith.constant 0.000000e+00 : f32
    %537 = vector.broadcast %cst_353 : f32 to vector<8x128xf32>
    %538 = arith.cmpf one, %520, %537 : vector<8x128xf32>
    %539 = arith.extui %538 : vector<8x128xi1> to vector<8x128xi32>
    %540 = arith.sitofp %539 : vector<8x128xi32> to vector<8x128xf32>
    %c0_354 = arith.constant 0 : index
    %c19 = arith.constant 19 : index
    %c0_355 = arith.constant 0 : index
    %c0_356 = arith.constant 0 : index
    %541 = vector.load %arg4[%c0_354, %c19, %c0_355, %c0_356] : memref<1x22x8x128xf32, #tpu.memory_space<vmem>>, vector<1x1x8x128xf32>
    %542 = vector.shape_cast %541 : vector<1x1x8x128xf32> to vector<8x128xf32>
    %543 = vector.shape_cast %540 : vector<8x128xf32> to vector<1x8x128xf32>
    %cst_357 = arith.constant dense<0.000000e+00> : vector<8x128xf32>
    %544 = vector.multi_reduction <add>, %543, %cst_357 [0] : vector<1x8x128xf32> to vector<8x128xf32>
    %545 = arith.addf %542, %544 : vector<8x128xf32>
    %c0_358 = arith.constant 0 : index
    %c19_359 = arith.constant 19 : index
    %c0_360 = arith.constant 0 : index
    %c0_361 = arith.constant 0 : index
    %546 = vector.load %arg4[%c0_358, %c19_359, %c0_360, %c0_361] : memref<1x22x8x128xf32, #tpu.memory_space<vmem>>, vector<1x1x8x128xf32>
    %547 = vector.shape_cast %546 : vector<1x1x8x128xf32> to vector<8x128xf32>
    %548 = vector.shape_cast %545 : vector<8x128xf32> to vector<1x1x8x128xf32>
    tpu.vector_store %arg4[%c0_358, %c19_359, %c0_360, %c0_361], %548 {strides = array<i32>} : memref<1x22x8x128xf32, #tpu.memory_space<vmem>>, vector<1x1x8x128xf32>,
    %c0_362 = arith.constant 0 : index
    %c20 = arith.constant 20 : index
    %c0_363 = arith.constant 0 : index
    %c0_364 = arith.constant 0 : index
    %549 = vector.load %arg4[%c0_362, %c20, %c0_363, %c0_364] : memref<1x22x8x128xf32, #tpu.memory_space<vmem>>, vector<1x1x8x128xf32>
    %550 = vector.shape_cast %549 : vector<1x1x8x128xf32> to vector<8x128xf32>
    %551 = arith.subf %529, %520 : vector<8x128xf32>
    %552 = math.absf %551 : vector<8x128xf32>
    %cst_365 = arith.constant 1.000000e+00 : f32
    %553 = vector.broadcast %cst_365 : f32 to vector<8x128xf32>
    %554 = arith.cmpf olt, %552, %553 : vector<8x128xf32>
    %cst_366 = arith.constant 5.000000e-01 : f32
    %555 = vector.broadcast %cst_366 : f32 to vector<8x128xf32>
    %556 = arith.mulf %555, %552 : vector<8x128xf32>
    %557 = arith.mulf %556, %552 : vector<8x128xf32>
    %cst_367 = arith.constant 5.000000e-01 : f32
    %558 = vector.broadcast %cst_367 : f32 to vector<8x128xf32>
    %559 = arith.subf %552, %558 : vector<8x128xf32>
    %560 = arith.select %554, %557, %559 : vector<8x128xi1>, vector<8x128xf32>
    %561 = arith.mulf %560, %540 : vector<8x128xf32>
    %562 = vector.shape_cast %561 : vector<8x128xf32> to vector<1x8x128xf32>
    %cst_368 = arith.constant dense<0.000000e+00> : vector<8x128xf32>
    %563 = vector.multi_reduction <add>, %562, %cst_368 [0] : vector<1x8x128xf32> to vector<8x128xf32>
    %564 = arith.addf %550, %563 : vector<8x128xf32>
    %c0_369 = arith.constant 0 : index
    %c20_370 = arith.constant 20 : index
    %c0_371 = arith.constant 0 : index
    %c0_372 = arith.constant 0 : index
    %565 = vector.load %arg4[%c0_369, %c20_370, %c0_371, %c0_372] : memref<1x22x8x128xf32, #tpu.memory_space<vmem>>, vector<1x1x8x128xf32>
    %566 = vector.shape_cast %565 : vector<1x1x8x128xf32> to vector<8x128xf32>
    %567 = vector.shape_cast %564 : vector<8x128xf32> to vector<1x1x8x128xf32>
    tpu.vector_store %arg4[%c0_369, %c20_370, %c0_371, %c0_372], %567 {strides = array<i32>} : memref<1x22x8x128xf32, #tpu.memory_space<vmem>>, vector<1x1x8x128xf32>,
    %c0_373 = arith.constant 0 : index
    %c21 = arith.constant 21 : index
    %c0_374 = arith.constant 0 : index
    %c0_375 = arith.constant 0 : index
    %568 = vector.load %arg4[%c0_373, %c21, %c0_374, %c0_375] : memref<1x22x8x128xf32, #tpu.memory_space<vmem>>, vector<1x1x8x128xf32>
    %569 = vector.shape_cast %568 : vector<1x1x8x128xf32> to vector<8x128xf32>
    %570 = arith.subf %536, %522 : vector<8x128xf32>
    %571 = math.absf %570 : vector<8x128xf32>
    %cst_376 = arith.constant 1.000000e+00 : f32
    %572 = vector.broadcast %cst_376 : f32 to vector<8x128xf32>
    %573 = arith.cmpf olt, %571, %572 : vector<8x128xf32>
    %cst_377 = arith.constant 5.000000e-01 : f32
    %574 = vector.broadcast %cst_377 : f32 to vector<8x128xf32>
    %575 = arith.mulf %574, %571 : vector<8x128xf32>
    %576 = arith.mulf %575, %571 : vector<8x128xf32>
    %cst_378 = arith.constant 5.000000e-01 : f32
    %577 = vector.broadcast %cst_378 : f32 to vector<8x128xf32>
    %578 = arith.subf %571, %577 : vector<8x128xf32>
    %579 = arith.select %573, %576, %578 : vector<8x128xi1>, vector<8x128xf32>
    %580 = arith.mulf %579, %540 : vector<8x128xf32>
    %581 = vector.shape_cast %580 : vector<8x128xf32> to vector<1x8x128xf32>
    %cst_379 = arith.constant dense<0.000000e+00> : vector<8x128xf32>
    %582 = vector.multi_reduction <add>, %581, %cst_379 [0] : vector<1x8x128xf32> to vector<8x128xf32>
    %583 = arith.addf %569, %582 : vector<8x128xf32>
    %c0_380 = arith.constant 0 : index
    %c21_381 = arith.constant 21 : index
    %c0_382 = arith.constant 0 : index
    %c0_383 = arith.constant 0 : index
    %584 = vector.load %arg4[%c0_380, %c21_381, %c0_382, %c0_383] : memref<1x22x8x128xf32, #tpu.memory_space<vmem>>, vector<1x1x8x128xf32>
    %585 = vector.shape_cast %584 : vector<1x1x8x128xf32> to vector<8x128xf32>
    %586 = vector.shape_cast %583 : vector<8x128xf32> to vector<1x1x8x128xf32>
    tpu.vector_store %arg4[%c0_380, %c21_381, %c0_382, %c0_383], %586 {strides = array<i32>} : memref<1x22x8x128xf32, #tpu.memory_space<vmem>>, vector<1x1x8x128xf32>,
    return
  }
  func.func @transform_0(%arg0: i32, %arg1: i32) -> (i32, i32, i32, i32) {
    %c0_i32 = arith.constant 0 : i32
    %c0_i32_0 = arith.constant 0 : i32
    %c0_i32_1 = arith.constant 0 : i32
    return %arg0, %c0_i32, %arg1, %c0_i32_0 : i32, i32, i32, i32
  }
  func.func @transform_1(%arg0: i32, %arg1: i32) -> (i32, i32, i32, i32) {
    %c0_i32 = arith.constant 0 : i32
    %c0_i32_0 = arith.constant 0 : i32
    %c0_i32_1 = arith.constant 0 : i32
    return %arg0, %c0_i32, %arg1, %c0_i32_0 : i32, i32, i32, i32
  }
  func.func @transform_2(%arg0: i32, %arg1: i32) -> (i32, i32, i32, i32) {
    %c0_i32 = arith.constant 0 : i32
    %c0_i32_0 = arith.constant 0 : i32
    %c0_i32_1 = arith.constant 0 : i32
    %c0_i32_2 = arith.constant 0 : i32
    return %arg0, %c0_i32, %c0_i32_0, %c0_i32_1 : i32, i32, i32, i32
  }
}

</mosaic_0001>

<bundles_post_ra>
// kernel: _loss_components.1
= control target key start
LH: loop header
LB: loop body
LE: loop exit
PB: predicated region body
PF: predicated region fallthrough
CT: control target
= control target key end

     0   :  { %s1006_s9 = smov 0   ;;  %s1008_s10 = smov 0   ;;  %s1294_s0 = inlined_call_operand.vmem [shape: f32[2,16,8,128], index: 0, kind: input, shape index: {}]   ;;  %s1295_s1 = inlined_call_operand.vmem [shape: f32[2,16,8,128], index: 1, kind: input, shape index: {}]   ;;  %s1296_s2 = inlined_call_operand.vmem [shape: f32[2,22,8,128], index: 2, kind: output, shape index: {}]  }
   0x1   :  { %s1010_s11 = smov 0  }
   0x2 LB: > { %s24_s12 = sadd.s32 1, %s984_s10  ;;  %p794_p0 = scmp.ge.s32.totalorder %s988_s11, 1  ;;  %s988_s11 = sphi %s1010_s11, %s12_s11   ;;  %s984_s10 = sphi %s1008_s10, %s1306_s10   ;;  %s980_s9 = sphi %s1006_s9, %s1305_s9  }
   0x3   : > { %p26_p1 = scmp.ge.s32.totalorder %s24_s12, 2  ;;  %p144_p2 = scmp.lt.s32.totalorder %s988_s11, 3 }
   0x5   : > { %s1308_s12 = smov (%p26_p1, %s24_s12), 0  ;;  %p145_p3 = pnand %p794_p0, %p144_p2 }
   0x6   : > { %p177_p4 = scmp.lt.s32.totalorder (!%p145_p3), %s980_s9, 1  ;;  %v990_v5 = vmov (!%p145_p3), 0.0  }
   0x7   : > { %148 = sbr.rel (%p145_p3) target bundleno = 120 (0x78), region = 28 }
   0xe   : > { %s1310_s9 = smov (!%p177_p4, %s980_s9), 1 }
   0xf   : > { %s908_s13 = smul.u32 176, %s1310_s9  ;;  %s906_s14 = sshll.u32 %s1310_s9, 7 }
  0x10   : > { %s1027_s17 = scalar_lea.vmem %s1294_s0, %s906_s14  ;;  %s1032_s20 = scalar_lea.vmem %s1295_s1, %s906_s14 }
  0x11   : > { %v1035_v0 = vld [vmem:[%s1027_s17 + $0x78] sm:$0xff]  ;;  %v1039_v2 = vld [vmem:[%s1027_s17 + $0x70] sm:$0xff]  ;;  %s1046_s23 = scalar_lea.vmem %s1296_s2, %s908_s13  ;;  %v303_v8 = vld [vmem:[%s1027_s17] sm:$0xff] }
  0x12   : > { %v801_v1 = vld [vmem:[%s1032_s20 + $0x78] sm:$0xff]  ;;  %v234_v3 = vand.u32 2147483647, %v1035_v0  ;;  %v808_v4 = vld [vmem:[%s1032_s20 + $0x70] sm:$0xff]  ;;  %v273_v7 = vand.u32 2147483647, %v1039_v2 }
  0x13   : > { %vm228_vm0 = vcmp.ne.f32.partialorder %v801_v1, 0.0  ;;  %vm267_vm1 = vcmp.ne.f32.partialorder %v808_v4, 0.0  ;;  %v304_v11 = vld [vmem:[%s1032_s20] sm:$0xff]  ;;  %v311_v15 = vand.u32 2147483647, %v303_v8  ;;  %v823_v16 = vld [vmem:[%s1027_s17 + $0x38] sm:$0xff]  ;;  %v232_v17 = vmul.f32 %v801_v1, %v1035_v0 }
  0x14   : > { %v1049_v6 = vsel %vm228_vm0, 1.0, %v990_v5  ;;  %v235_v9 = vsub.f32 0.0, %v234_v3  ;;  %v1054_v10 = vsel %vm267_vm1, 1.0, %v990_v5  ;;  %v274_v12 = vsub.f32 0.0, %v273_v7  ;;  %v824_v19 = vld [vmem:[%s1032_s20 + $0x38] sm:$0xff]  ;;  %v1068_v20 = vld [vmem:[%s1032_s20 + $0x8] sm:$0xff] }
  0x15   : > { %vm305_vm2 = vcmp.ne.f32.partialorder %v304_v11, 0.0  ;;  %251 = vst [vmem:[%s1046_s23] sm:$0xff] %v1049_v6  ;;  %811 = vst [vmem:[%s1046_s23 + $0x18] sm:$0xff] %v1054_v10  ;;  %v231_v21 = vmax.f32 %v1035_v0, 0.0  ;;  %v312_v22 = vsub.f32 0.0, %v311_v15  ;;  %vm345_vm3 = vcmp.ne.f32.partialorder %v824_v19, 0.0  ;;  %v1072_v23 = vld [vmem:[%s1032_s20 + $0x10] sm:$0xff] }
  0x16   : > { %v236_v13 = vmul.f32 1.442695, %v235_v9  ;;  %v1060_v14 = vsel %vm305_vm2, 1.0, %v990_v5  ;;  %v275_v18 = vmul.f32 1.442695, %v274_v12  ;;  %v1075_v24 = vld [vmem:[%s1032_s20 + $0x18] sm:$0xff]  ;;  %v271_v28 = vmul.f32 %v808_v4, %v1039_v2 }
  0x17   : > { %v270_v25 = vmax.f32 %v1039_v2, 0.0  ;;  %818 = vst [vmem:[%s1046_s23 + $0x30] sm:$0xff] %v1060_v14  ;;  %v1081_v26 = vsel %vm345_vm3, 1.0, %v990_v5  ;;  %v351_v27 = vand.u32 2147483647, %v823_v16  ;;  %v1085_v30 = vld [vmem:[%s1032_s20 + $0x20] sm:$0xff]  ;;  %v309_v33 = vmul.f32 %v304_v11, %v303_v8 }
  0x18   : > { %934 = vpow2.f32 %v236_v13  ;;  %v313_v29 = vmul.f32 1.442695, %v312_v22  ;;  %v397_v31 = vand.u32 2147483647, %v1068_v20  ;;  %v1089_v32 = vld [vmem:[%s1032_s20 + $0x40] sm:$0xff]  ;;  %v1094_v37 = vld [vmem:[%s1032_s20 + $0x48] sm:$0xff]  ;;  %v349_v39 = vmul.f32 %v824_v19, %v823_v16 }
  0x19   : > { %936 = vpow2.f32 %v275_v18  ;;  %v352_v34 = vsub.f32 0.0, %v351_v27  ;;  %v398_v35 = vand.u32 2147483647, %v1072_v23  ;;  %v400_v36 = vand.u32 2147483647, %v1075_v24  ;;  %827 = vst [vmem:[%s1046_s23 + $0x48] sm:$0xff] %v1081_v26 }
  0x1a   : > { %938 = vpow2.f32 %v313_v29  ;;  %v308_v38 = vmax.f32 %v303_v8, 0.0  ;;  %v348_v40 = vmax.f32 %v823_v16, 0.0  ;;  %v1099_v41 = vld [vmem:[%s1032_s20 + $0x50] sm:$0xff]  ;;  %v1102_v42 = vld [vmem:[%s1032_s20 + $0x28] sm:$0xff]  ;;  %v402_v46 = vand.u32 2147483647, %v1085_v30 }
  0x1b   : > { %v876_v43 = vld [vmem:[%s1027_s17 + $0x28] sm:$0xff]  ;;  %v353_v44 = vmul.f32 1.442695, %v352_v34  ;;  %v399_v45 = vadd.f32 %v398_v35, %v397_v31  ;;  %v504_v47 = vand.u32 2147483647, %v1089_v32  ;;  %vm615_vm4 = vcmp.ne.f32.partialorder %v1102_v42, 0.0 }
  0x1c   : > { %v505_v48 = vand.u32 2147483647, %v1094_v37  ;;  %v877_v49 = vmul.f32 -1.442695, %v876_v43  ;;  %v878_v50 = vld [vmem:[%s1027_s17 + $0x30] sm:$0xff]  ;;  %v1110_v51 = vsub.f32 %v231_v21, %v232_v17  ;;  %v1113_v53 = vld [vmem:[%s1032_s20 + $0x58] sm:$0xff]  ;;  %v1118_v55 = vsub.f32 %v270_v25, %v271_v28 }
  0x1d   : > { %940 = vpow2.f32 %v353_v44  ;;  %v401_v52 = vadd.f32 %v400_v36, %v399_v45  ;;  %v1116_v54 = vsel %vm615_vm4, 1.0, %v990_v5  ;;  %v1120_v56 = vsub.f32 %v308_v38, %v309_v33  ;;  %v1126_v61 = vld [vmem:[%s1032_s20 + $0x60] sm:$0xff]  ;;  %v836_v13 = vld [vmem:[%s1027_s17 + $0x8] sm:$0xff]  ;;  %v837_v16 = vld [vmem:[%s1027_s17 + $0x10] sm:$0xff] }
  0x1e   : > { %v879_v57 = vmul.f32 -1.442695, %v878_v50  ;;  %v1122_v58 = vsub.f32 %v348_v40, %v349_v39  ;;  %v507_v60 = vand.u32 2147483647, %v1099_v41  ;;  %942 = vpow2.f32 %v877_v49  ;;  %882 = vst [vmem:[%s1046_s23 + $0x80] sm:$0xff] %v1116_v54  ;;  %v891_v1 = vld [vmem:[%s1027_s17 + $0x60] sm:$0xff] }
  0x1f   : > { %v403_v59 = vadd.f32 %v402_v46, %v401_v52  ;;  %v506_v63 = vadd.f32 %v505_v48, %v504_v47  ;;  %v509_v0 = vand.u32 2147483647, %v1113_v53  ;;  %vm669_vm5 = vcmp.ne.f32.partialorder %v1126_v61, 0.0  ;;  %v838_v17 = vld [vmem:[%s1027_s17 + $0x18] sm:$0xff]  ;;  %v839_v22 = vld [vmem:[%s1027_s17 + $0x20] sm:$0xff] }
  0x20   : > { %944 = vpow2.f32 %v879_v57  ;;  %v1137_v18 = vmul.f32 -1.442695, %v891_v1  ;;  %v1145_v27 = vsel %vm669_vm5, 1.0, %v990_v5 }
  0x21   : > { %vm404_vm6 = vcmp.ne.f32.partialorder %v403_v59, 0.0  ;;  %v1140_v25 = vadd.f32 %v507_v60, %v506_v63  ;;  %897 = vst [vmem:[%s1046_s23 + $0x98] sm:$0xff] %v1145_v27 }
  0x22   : > { %v935_v62 = vpop.eup %934  ;;  %v840_v12 = vsel %vm404_vm6, 1.0, %v990_v5 }
  0x23   : > { %v937_v2 = vpop.eup %936  ;;  %v238_v3 = vadd.f32 1.0, %v935_v62  ;;  %v241_v4 = vmul.f32 -0.5, %v935_v62  ;;  %v244_v7 = vand.u32 2147483647, %v935_v62  ;;  %850 = vst [vmem:[%s1046_s23 + $0x60] sm:$0xff] %v840_v12  ;;  %v1152_v34 = vmul.f32 %v840_v12, %v836_v13 }
  0x24   : > { %v277_v8 = vadd.f32 1.0, %v937_v2  ;;  %v280_v9 = vmul.f32 -0.5, %v937_v2  ;;  %v283_v11 = vand.u32 2147483647, %v937_v2  ;;  %v939_v19 = vpop.eup %938  ;;  %v1158_v39 = vmul.f32 %v840_v12, %v837_v16 }
  0x25   : > { %946 = vlog2.f32 %v238_v3  ;;  %v242_v15 = vadd.f32 1.0, %v241_v4  ;;  %vm1147_vm7 = vcmp.lt.f32.partialorder %v244_v7, 0.0004427343  ;;  %v315_v29 = vadd.f32 1.0, %v939_v19 }
  0x26   : > { %948 = vlog2.f32 %v277_v8  ;;  %v281_v21 = vadd.f32 1.0, %v280_v9  ;;  %v318_v31 = vmul.f32 -0.5, %v939_v19  ;;  %v321_v33 = vand.u32 2147483647, %v939_v19 }
  0x27   : > { %v243_v35 = vmul.f32 %v935_v62, %v242_v15  ;;  %vm1154_vm8 = vcmp.lt.f32.partialorder %v283_v11, 0.0004427343  ;;  %v1160_v40 = vmul.f32 %v840_v12, %v838_v17  ;;  %v941_v43 = vpop.eup %940  ;;  %950 = vlog2.f32 %v315_v29 }
  0x28   : > { %v282_v36 = vmul.f32 %v937_v2, %v281_v21  ;;  %v319_v44 = vadd.f32 1.0, %v318_v31  ;;  %v1162_v45 = vmul.f32 %v840_v12, %v839_v22  ;;  %v1165_v46 = vmul.f32 %v840_v12, %v1068_v20  ;;  %v1170_v52 = vpop.eup %942 }
  0x29   : > { %v355_v47 = vadd.f32 1.0, %v941_v43  ;;  %v358_v48 = vmul.f32 -0.5, %v941_v43  ;;  %v361_v49 = vand.u32 2147483647, %v941_v43  ;;  %v1168_v50 = vmul.f32 %v840_v12, %v1072_v23 }
  0x2a   : > { %vm1172_vm9 = vcmp.lt.f32.partialorder %v321_v33, 0.0004427343  ;;  %v1177_v59 = vmul.f32 %v840_v12, %v1075_v24  ;;  %v1180_v60 = vmul.f32 %v840_v12, %v1085_v30  ;;  %v415_v20 = vsub.f32 %v1152_v34, %v1165_v46  ;;  %v1184_v62 = vpop.eup %944 }
  0x2b   : > { %v320_v63 = vmul.f32 %v939_v19, %v319_v44  ;;  %952 = vlog2.f32 %v355_v47  ;;  %v359_v23 = vadd.f32 1.0, %v358_v48  ;;  %v422_v1 = vsub.f32 %v1158_v39, %v1168_v50 }
  0x2c   : > { %v416_v2 = vand.u32 2147483647, %v415_v20  ;;  %v430_v3 = vsub.f32 %v1160_v40, %v1177_v59  ;;  %v438_v24 = vsub.f32 %v1162_v45, %v1180_v60  ;;  %v446_v30 = vsub.f32 %v1160_v40, %v1165_v46 }
  0x2d   : > { %v360_v4 = vmul.f32 %v941_v43, %v359_v23  ;;  %vm1194_vm10 = vcmp.lt.f32.partialorder %v361_v49, 0.0004427343  ;;  %v423_v8 = vand.u32 2147483647, %v422_v1  ;;  %v453_v9 = vsub.f32 %v1162_v45, %v1168_v50 }
  0x2e   : > { %v461_v11 = vsub.f32 %v1152_v34, %v1177_v59  ;;  %vm417_vm11 = vcmp.lt.f32.partialorder %v416_v2, 1.0  ;;  %v418_v13 = vmul.f32 0.5, %v416_v2  ;;  %v841_v15 = vadd.f32 -0.5, %v416_v2 }
  0x2f   : > { %v947_v12 = vpop.eup %946  ;;  %v431_v16 = vand.u32 2147483647, %v430_v3  ;;  %vm424_vm12 = vcmp.lt.f32.partialorder %v423_v8, 1.0  ;;  %v425_v21 = vmul.f32 0.5, %v423_v8  ;;  %v842_v22 = vadd.f32 -0.5, %v423_v8 }
  0x30   : > { %v949_v17 = vpop.eup %948  ;;  %v240_v19 = vmul.f32 0.6931472, %v947_v12  ;;  %v419_v31 = vmul.f32 %v418_v13, %v416_v2  ;;  %v439_v34 = vand.u32 2147483647, %v438_v24  ;;  %v454_v57 = vand.u32 2147483647, %v453_v9 }
  0x31   : > { %v279_v29 = vmul.f32 0.6931472, %v949_v17  ;;  %vm432_vm13 = vcmp.lt.f32.partialorder %v431_v16, 1.0  ;;  %v433_v33 = vmul.f32 0.5, %v431_v16  ;;  %v426_v43 = vmul.f32 %v425_v21, %v423_v8  ;;  %v951_v45 = vpop.eup %950 }
  0x32   : > { %v246_v40 = vsel %vm1147_vm7, %v243_v35, %v240_v19  ;;  %v843_v44 = vadd.f32 -0.5, %v431_v16  ;;  %v421_v48 = vsel %vm417_vm11, %v419_v31, %v841_v15  ;;  %v317_v59 = vmul.f32 0.6931472, %v951_v45 }
  0x33   : > { %v247_v46 = vadd.f32 %v246_v40, %v1110_v51  ;;  %v285_v47 = vsel %vm1154_vm8, %v282_v36, %v279_v29  ;;  %v434_v49 = vmul.f32 %v433_v33, %v431_v16  ;;  %v428_v28 = vsel %vm424_vm12, %v426_v43, %v842_v22  ;;  %v859_v40 = vld [vmem:[%s1027_s17 + $0x50] sm:$0xff]  ;;  %v860_v43 = vld [vmem:[%s1027_s17 + $0x58] sm:$0xff] }
  0x34   : > { %v286_v50 = vadd.f32 %v285_v47, %v1118_v55  ;;  %vm440_vm14 = vcmp.lt.f32.partialorder %v439_v34, 1.0  ;;  %v429_v20 = vadd.f32 %v428_v28, %v421_v48  ;;  %v323_v38 = vsel %vm1172_vm9, %v320_v63, %v317_v59 }
  0x35   : > { %v254_v35 = vmul.f32 %v1049_v6, %v247_v46  ;;  %v436_v23 = vsel %vm432_vm13, %v434_v49, %v843_v44  ;;  %v953_v51 = vpop.eup %952  ;;  %v441_v1 = vmul.f32 0.5, %v439_v34  ;;  %806 = vst [vmem:[%s1046_s23 + $0x10] sm:$0xff] %v247_v46  ;;  %v324_v55 = vadd.f32 %v323_v38, %v1120_v56 }
  0x36   : > { %v294_v36 = vmul.f32 %v1054_v10, %v286_v50  ;;  %v357_v2 = vmul.f32 0.6931472, %v953_v51  ;;  %v437_v3 = vadd.f32 %v436_v23, %v429_v20  ;;  %815 = vst [vmem:[%s1046_s23 + $0x28] sm:$0xff] %v286_v50  ;;  %v844_v6 = vadd.f32 -0.5, %v439_v34  ;;  %v893_v20 = vld [vmem:[%s1027_s17 + $0x68] sm:$0xff] }
  0x37   : > { %v442_v24 = vmul.f32 %v441_v1, %v439_v34  ;;  %v447_v8 = vand.u32 2147483647, %v446_v30  ;;  %804 = vst [vmem:[%s1046_s23 + $0x8] sm:$0xff] %v254_v35  ;;  %v332_v12 = vmul.f32 %v1060_v14, %v324_v55  ;;  %822 = vst [vmem:[%s1046_s23 + $0x40] sm:$0xff] %v324_v55  ;;  %vm455_vm0 = vcmp.lt.f32.partialorder %v454_v57, 1.0 }
  0x38   : > { %v363_v10 = vsel %vm1194_vm10, %v360_v4, %v357_v2  ;;  %813 = vst [vmem:[%s1046_s23 + $0x20] sm:$0xff] %v294_v36  ;;  %v456_v7 = vmul.f32 0.5, %v454_v57  ;;  %v846_v4 = vadd.f32 -0.5, %v454_v57  ;;  %v462_v9 = vand.u32 2147483647, %v461_v11 }
  0x39   : > { %v364_v63 = vadd.f32 %v363_v10, %v1122_v58  ;;  %v444_v56 = vsel %vm440_vm14, %v442_v24, %v844_v6  ;;  %vm448_vm15 = vcmp.lt.f32.partialorder %v447_v8, 1.0  ;;  %v449_v13 = vmul.f32 0.5, %v447_v8  ;;  %820 = vst [vmem:[%s1046_s23 + $0x38] sm:$0xff] %v332_v12 }
  0x3a   : > { %v1226_v15 = vadd.f32 %v444_v56, %v437_v3  ;;  %v845_v30 = vadd.f32 -0.5, %v447_v8  ;;  %v469_v58 = vsub.f32 %v1158_v39, %v1180_v60  ;;  %v510_v17 = vadd.f32 %v509_v0, %v1140_v25  ;;  %v857_v39 = vld [vmem:[%s1027_s17 + $0x40] sm:$0xff] }
  0x3b   : > { %v372_v16 = vmul.f32 %v1081_v26, %v364_v63  ;;  %v450_v14 = vmul.f32 %v449_v13, %v447_v8  ;;  %831 = vst [vmem:[%s1046_s23 + $0x58] sm:$0xff] %v364_v63  ;;  %v457_v21 = vmul.f32 %v456_v7, %v454_v57  ;;  %v604_v26 = vadd.f32 1.0, %v1170_v52  ;;  %v858_v52 = vld [vmem:[%s1027_s17 + $0x48] sm:$0xff] }
  0x3c   : > { %vm463_vm1 = vcmp.lt.f32.partialorder %v462_v9, 1.0  ;;  %v464_v22 = vmul.f32 0.5, %v462_v9  ;;  %v847_v29 = vadd.f32 -0.5, %v462_v9  ;;  %v470_v31 = vand.u32 2147483647, %v469_v58 }
  0x3d   : > { %v452_v19 = vsel %vm448_vm15, %v450_v14, %v845_v30  ;;  %829 = vst [vmem:[%s1046_s23 + $0x50] sm:$0xff] %v372_v16  ;;  %v459_v11 = vsel %vm455_vm0, %v457_v21, %v846_v4  ;;  %vm511_vm2 = vcmp.ne.f32.partialorder %v510_v17, 0.0  ;;  %954 = vrcp.f32 %v604_v26 }
  0x3e   : > { %v612_v0 = vadd.f32 1.0, %v1184_v62  ;;  %v460_v25 = vadd.f32 %v459_v11, %v452_v19  ;;  %v465_v60 = vmul.f32 %v464_v22, %v462_v9  ;;  %vm471_vm3 = vcmp.lt.f32.partialorder %v470_v31, 1.0 }
  0x3f   : > { %v472_v33 = vmul.f32 0.5, %v470_v31  ;;  %v848_v44 = vadd.f32 -0.5, %v470_v31  ;;  %v861_v34 = vsel %vm511_vm2, 1.0, %v990_v5 }
  0x40   : > { %956 = vrcp.f32 %v612_v0  ;;  %v467_v45 = vsel %vm463_vm1, %v465_v60, %v847_v29  ;;  %v1246_v47 = vmul.f32 %v861_v34, %v857_v39  ;;  %v1248_v48 = vmul.f32 %v861_v34, %v858_v52  ;;  %871 = vst [vmem:[%s1046_s23 + $0x70] sm:$0xff] %v861_v34  ;;  %v875_v0 = vld [vmem:[%s1032_s20 + $0x30] sm:$0xff] }
  0x41   : > { %v473_v46 = vmul.f32 %v472_v33, %v470_v31  ;;  %v468_v62 = vadd.f32 %v467_v45, %v460_v25  ;;  %v516_v49 = vmul.f32 %v861_v34, %v859_v40  ;;  %v517_v50 = vmul.f32 %v861_v34, %v860_v43 }
  0x42   : > { %v518_v28 = vmul.f32 %v861_v34, %v1089_v32  ;;  %v519_v5 = vmul.f32 %v861_v34, %v1094_v37  ;;  %v520_v35 = vmul.f32 %v861_v34, %v1099_v41  ;;  %v521_v51 = vmul.f32 %v861_v34, %v1113_v53 }
  0x43   : > { %v475_v59 = vsel %vm471_vm3, %v473_v46, %v848_v44  ;;  %958 = vpow2.f32 %v1137_v18  ;;  %v1263_v37 = vmul.f32 -1.442695, %v893_v20 }
  0x44   : > { %v476_v23 = vadd.f32 %v475_v59, %v468_v62  ;;  %v522_v36 = vsub.f32 %v1246_v47, %v518_v28  ;;  %v529_v38 = vsub.f32 %v1248_v48, %v519_v5  ;;  %v537_v1 = vsub.f32 %v516_v49, %v520_v35 }
  0x45   : > { %v553_v55 = vsub.f32 %v516_v49, %v518_v28  ;;  %v545_v3 = vsub.f32 %v517_v50, %v521_v51  ;;  %v560_v32 = vsub.f32 %v517_v50, %v519_v5  ;;  %v568_v53 = vsub.f32 %v1246_v47, %v520_v35 }
  0x46   : > { %v484_v2 = vmin.f32 %v1226_v15, %v476_v23  ;;  %v523_v41 = vand.u32 2147483647, %v522_v36  ;;  %v530_v24 = vand.u32 2147483647, %v529_v38  ;;  %v538_v6 = vand.u32 2147483647, %v537_v1 }
  0x47   : > { %v955_v8 = vpop.eup %954  ;;  %v546_v18 = vand.u32 2147483647, %v545_v3  ;;  %v554_v12 = vand.u32 2147483647, %v553_v55  ;;  %v576_v10 = vsub.f32 %v1248_v48, %v521_v51  ;;  %v561_v56 = vand.u32 2147483647, %v560_v32 }
  0x48   : > { %vm524_vm4 = vcmp.lt.f32.partialorder %v523_v41, 1.0  ;;  %v525_v57 = vmul.f32 0.5, %v523_v41  ;;  %v862_v63 = vadd.f32 -0.5, %v523_v41  ;;  %852 = vst [vmem:[%s1046_s23 + $0x68] sm:$0xff] %v484_v2  ;;  %vm531_vm5 = vcmp.lt.f32.partialorder %v530_v24, 1.0 }
  0x49   : > { %v532_v15 = vmul.f32 0.5, %v530_v24  ;;  %v863_v30 = vadd.f32 -0.5, %v530_v24  ;;  %v540_v16 = vmul.f32 0.5, %v538_v6  ;;  %vm539_vm6 = vcmp.lt.f32.partialorder %v538_v6, 1.0 }
  0x4a   : > { %v957_v13 = vpop.eup %956  ;;  %v526_v14 = vmul.f32 %v525_v57, %v523_v41  ;;  %v864_v7 = vadd.f32 -0.5, %v538_v6  ;;  %v548_v4 = vmul.f32 0.5, %v546_v18  ;;  %vm547_vm7 = vcmp.lt.f32.partialorder %v546_v18, 1.0 }
  0x4b   : > { %v533_v9 = vmul.f32 %v532_v15, %v530_v24  ;;  %v541_v58 = vmul.f32 %v540_v16, %v538_v6  ;;  %v865_v17 = vadd.f32 -0.5, %v546_v18  ;;  %v556_v26 = vmul.f32 0.5, %v554_v12 }
  0x4c   : > { %v528_v19 = vsel %vm524_vm4, %v526_v14, %v862_v63  ;;  %v549_v21 = vmul.f32 %v548_v4, %v546_v18  ;;  %v866_v22 = vadd.f32 -0.5, %v554_v12  ;;  %vm555_vm8 = vcmp.lt.f32.partialorder %v554_v12, 1.0 }
  0x4d   : > { %v959_v29 = vpop.eup %958  ;;  %v535_v31 = vsel %vm531_vm5, %v533_v9, %v863_v30  ;;  %v543_v11 = vsel %vm539_vm6, %v541_v58, %v864_v7  ;;  %v563_v39 = vmul.f32 0.5, %v561_v56  ;;  %v557_v60 = vmul.f32 %v556_v26, %v554_v12  ;;  %v890_v7 = vld [vmem:[%s1032_s20 + $0x68] sm:$0xff] }
  0x4e   : > { %v536_v25 = vadd.f32 %v535_v31, %v528_v19  ;;  %vm562_vm9 = vcmp.lt.f32.partialorder %v561_v56, 1.0  ;;  %v867_v33 = vadd.f32 -0.5, %v561_v56  ;;  %v569_v40 = vand.u32 2147483647, %v568_v53 }
  0x4f   : > { %v564_v52 = vmul.f32 %v563_v39, %v561_v56  ;;  %v577_v43 = vand.u32 2147483647, %v576_v10  ;;  %v625_v44 = vsub.f32 %v955_v8, %v1102_v42  ;;  %v551_v34 = vsel %vm547_vm7, %v549_v21, %v865_v17 }
  0x50   : > { %v559_v45 = vsel %vm555_vm8, %v557_v60, %v866_v22  ;;  %v638_v46 = vsub.f32 %v957_v13, %v875_v0  ;;  %v658_v47 = vadd.f32 1.0, %v959_v29  ;;  %v544_v62 = vadd.f32 %v543_v11, %v536_v25 }
  0x51   : > { %v566_v48 = vsel %vm562_vm9, %v564_v52, %v867_v33  ;;  %v571_v49 = vmul.f32 0.5, %v569_v40  ;;  %v868_v50 = vadd.f32 -0.5, %v569_v40  ;;  %vm570_vm10 = vcmp.lt.f32.partialorder %v569_v40, 1.0 }
  0x52   : > { %v567_v59 = vadd.f32 %v566_v48, %v559_v45  ;;  %vm578_vm11 = vcmp.lt.f32.partialorder %v577_v43, 1.0  ;;  %v579_v28 = vmul.f32 0.5, %v577_v43  ;;  %v869_v35 = vadd.f32 -0.5, %v577_v43 }
  0x53   : > { %v572_v5 = vmul.f32 %v571_v49, %v569_v40  ;;  %v626_v20 = vand.u32 2147483647, %v625_v44  ;;  %v639_v23 = vand.u32 2147483647, %v638_v46  ;;  %960 = vrcp.f32 %v658_v47 }
  0x54   : > { %v580_v51 = vmul.f32 %v579_v28, %v577_v43  ;;  %v552_v42 = vadd.f32 %v551_v34, %v544_v62  ;;  %962 = vpow2.f32 %v1263_v37 }
  0x55   : > { %v574_v36 = vsel %vm570_vm10, %v572_v5, %v868_v50  ;;  %v628_v38 = vmul.f32 0.5, %v626_v20  ;;  %v884_v1 = vadd.f32 -0.5, %v626_v20  ;;  %vm627_vm12 = vcmp.lt.f32.partialorder %v626_v20, 1.0 }
  0x56   : > { %v575_v55 = vadd.f32 %v574_v36, %v567_v59  ;;  %v582_v2 = vsel %vm578_vm11, %v580_v51, %v869_v35  ;;  %v641_v3 = vmul.f32 0.5, %v639_v23  ;;  %vm640_vm13 = vcmp.lt.f32.partialorder %v639_v23, 1.0 }
  0x57   : > { %v629_v32 = vmul.f32 %v628_v38, %v626_v20  ;;  %v887_v41 = vadd.f32 -0.5, %v639_v23 }
  0x58   : > { %v583_v24 = vadd.f32 %v582_v2, %v575_v55  ;;  %v642_v6 = vmul.f32 %v641_v3, %v639_v23 }
  0x59   : > { %v631_v53 = vsel %vm627_vm12, %v629_v32, %v884_v1 }
  0x5a   : > { %v591_v8 = vmin.f32 %v552_v42, %v583_v24  ;;  %v632_v18 = vmul.f32 %v1116_v54, %v631_v53  ;;  %v644_v12 = vsel %vm640_vm13, %v642_v6, %v887_v41 }
  0x5b   : > { %v645_v10 = vmul.f32 %v1116_v54, %v644_v12 }
  0x5c   : > { %873 = vst [vmem:[%s1046_s23 + $0x78] sm:$0xff] %v591_v8  ;;  %885 = vst [vmem:[%s1046_s23 + $0x88] sm:$0xff] %v632_v18 }
  0x5d   : > { %v961_v57 = vpop.eup %960  ;;  %888 = vst [vmem:[%s1046_s23 + $0x90] sm:$0xff] %v645_v10 }
  0x5e   : > { %v679_v63 = vsub.f32 %v961_v57, %v1126_v61  ;;  %v963_v56 = vpop.eup %962 }
  0x5f   : > { %v666_v37 = vadd.f32 1.0, %v963_v56 }
  0x60   : > { %v680_v13 = vand.u32 2147483647, %v679_v63 }
  0x61   : > { %964 = vrcp.f32 %v666_v37 }
  0x62   : > { %v682_v15 = vmul.f32 0.5, %v680_v13  ;;  %v899_v30 = vadd.f32 -0.5, %v680_v13  ;;  %vm681_vm14 = vcmp.lt.f32.partialorder %v680_v13, 1.0 }
  0x64   : > { %v683_v16 = vmul.f32 %v682_v15, %v680_v13 }
  0x66   : > { %v685_v14 = vsel %vm681_vm14, %v683_v16, %v899_v30 }
  0x67   : > { %v686_v54 = vmul.f32 %v1145_v27, %v685_v14 }
  0x69   : > { %900 = vst [vmem:[%s1046_s23 + $0xa0] sm:$0xff] %v686_v54 }
  0x6b   : > { %v965_v4 = vpop.eup %964 }
  0x6c   : > { %v692_v9 = vsub.f32 %v965_v4, %v890_v7 }
  0x6e   : > { %v693_v58 = vand.u32 2147483647, %v692_v9 }
  0x70   : > { %v695_v17 = vmul.f32 0.5, %v693_v58  ;;  %v902_v19 = vadd.f32 -0.5, %v693_v58  ;;  %vm694_vm15 = vcmp.lt.f32.partialorder %v693_v58, 1.0 }
  0x72   : > { %v696_v61 = vmul.f32 %v695_v17, %v693_v58 }
  0x74   : > { %v698_v21 = vsel %vm694_vm15, %v696_v61, %v902_v19 }
  0x75   : > { %v699_v26 = vmul.f32 %v1145_v27, %v698_v21 }
  0x77   : > { %903 = vst [vmem:[%s1046_s23 + $0xa8] sm:$0xff] %v699_v26 }
  0x78 PF: > { %s12_s11 = sadd.s32 1, %s988_s11   ;;  %s1305_s9 = smov %s984_s10 }
  0x79   : > { %p9_p5 = scmp.ge.s32.totalorder %s12_s11, 4   ;;  %s1306_s10 = smov %s1308_s12 }
  0x7b   :  { %11 = sbr.rel (!%p9_p5) target bundleno = 2 (0x2), region = 116 }

</bundles_post_ra>
